<compile_context>
chip_gen: v7x
topology: tpu7x:2x2x1
jax: 0.10.0
libtpu: 0.0.40
codegen_flags: <defaults>
</compile_context>

<pallas_src>
import functools

import jax
import jax.numpy as jnp
from jax.experimental import pallas as pl
from jax.experimental.pallas import tpu as pltpu

# ------------------------- scaled-down xlm-roberta config -------------------------
VOCAB = 128
HIDDEN = 32
N_HEADS = 4
HEAD_DIM = HIDDEN // N_HEADS
INTERMEDIATE = 64
N_LAYERS = 2
MAX_POS = 32
NUM_LABELS = 2          # config.num_labels default for xlm-roberta-base
PAD_ID = 1              # xlm-roberta padding_idx
LN_EPS = 1e-5
LANE = 128              # classifier output padded to a full lane tile
OUT_SUBLANES = 8        # output padded to a full (8, 128) store tile


# ------------------------------- fused Pallas kernel ------------------------------
def _encoder_classifier_kernel(
    x_ref, bias_ref,
    emb_g_ref, emb_b_ref,
    qkv_w_ref, qkv_b_ref, o_w_ref, o_b_ref,
    ln1_g_ref, ln1_b_ref,
    ff1_w_ref, ff1_b_ref, ff2_w_ref, ff2_b_ref,
    ln2_g_ref, ln2_b_ref,
    cls_w_ref, cls_b_ref,
    out_ref,
    *, n_heads, head_dim, n_layers, eps):
    """One batch element (grid axis 0 = batch). x_ref: (S, H), bias_ref: (1, S)."""
    f32, bf16 = jnp.float32, jnp.bfloat16
    H = n_heads * head_dim
    D = head_dim
    S = x_ref.shape[0]

    def layernorm(v, g, b):
        # One-pass statistics: the two lane reductions are independent.
        mu = jnp.mean(v, axis=-1, keepdims=True)
        ms = jnp.mean(v * v, axis=-1, keepdims=True)
        var = ms - mu * mu
        return (v - mu) * jax.lax.rsqrt(var + eps) * g + b

    # ---- embedding LayerNorm ----
    x = layernorm(x_ref[...].astype(f32), emb_g_ref[...], emb_b_ref[...])

    # Additive key-padding bias (1, S): 0 for valid keys, -1e9 for padding.
    bias = bias_ref[...]

    # ---- encoder layers (static unrolled Python loop) ----
    for l in range(n_layers):
        # Fused QKV projection: one (S, H) x (H, 3H) bf16 matmul, f32 accumulate.
        # (The 1/sqrt(head_dim) scale is pre-folded into the Q slab of the weights.)
        qkv = jnp.dot(x.astype(bf16), qkv_w_ref[l],
                      preferred_element_type=f32) + qkv_b_ref[l]          # (S, 3H) f32
        q_bf = qkv[:, 0:H].astype(bf16)
        k_bf = qkv[:, H:2 * H].astype(bf16)
        v_bf = qkv[:, 2 * H:3 * H].astype(bf16)

        # Per-head scores, stacked along sublanes so the mask-add + softmax
        # (max / exp / reciprocal) run ONCE per layer instead of once per head.
        s_parts = []
        for h in range(n_heads):
            s_parts.append(jax.lax.dot_general(
                q_bf[:, h * D:(h + 1) * D], k_bf[:, h * D:(h + 1) * D],
                (((1,), (1,)), ((), ())), preferred_element_type=f32))    # (S, S)
        s = jnp.concatenate(s_parts, axis=0) + bias                       # (nH*S, S)

        # Manual softmax; divide goes to the EUP via approximate reciprocal.
        m = jnp.max(s, axis=-1, keepdims=True)
        e = jnp.exp(s - m)
        p = (e * pl.reciprocal(jnp.sum(e, axis=-1, keepdims=True),
                               approx=True)).astype(bf16)                 # (nH*S, S)

        # Head merge folded into the output projection: sum_h ctx_h @ o_w[h-slab].
        o_w_l = o_w_ref[l]                                                # (H, H) bf16
        attn = jnp.zeros((S, H), f32)
        for h in range(n_heads):
            ctx_h = jnp.dot(p[h * S:(h + 1) * S, :],
                            v_bf[:, h * D:(h + 1) * D],
                            preferred_element_type=f32)                   # (S, D)
            attn = attn + jnp.dot(ctx_h.astype(bf16),
                                  o_w_l[h * D:(h + 1) * D, :],
                                  preferred_element_type=f32)             # (S, H)
        attn = attn + o_b_ref[l]
        x = layernorm(attn + x, ln1_g_ref[l], ln1_b_ref[l])               # post-attn LN

        # Feed-forward.
        ff = jnp.dot(x.astype(bf16), ff1_w_ref[l],
                     preferred_element_type=f32) + ff1_b_ref[l]
        # TODO(synk): HF xlm-roberta uses exact (erf) GELU; tanh approximation used here.
        ff = jax.nn.gelu(ff, approximate=True)
        ff = jnp.dot(ff.astype(bf16), ff2_w_ref[l],
                     preferred_element_type=f32) + ff2_b_ref[l]
        x = layernorm(ff + x, ln2_g_ref[l], ln2_b_ref[l])                 # post-FFN LN

    # ---- pooled output = CLS token (row 0 of this sequence); dropout is identity ----
    pooled = x[0:1, :]                                                    # (1, H)

    # ---- classifier head, lane-dense 128-wide, broadcast to a full (8,128) store ----
    logits = jnp.dot(pooled.astype(bf16), cls_w_ref[...],
                     preferred_element_type=f32) + cls_b_ref[...]         # (1, LANE)
    out_ref[...] = jnp.broadcast_to(logits, out_ref.shape).astype(out_ref.dtype)


# --------------------------------- model forward -----------------------------------
def _replicated_spec(arr):
    """Full-array VMEM block, same block for every grid step."""
    nd = arr.ndim
    return pl.BlockSpec(arr.shape, lambda b, _nd=nd: (0,) * _nd)


def custom_model_forward(params, input_ids, attention_mask):
    """Returns logits (B, NUM_LABELS); equivalent to CustomModel.forward(labels=None)."""
    B, S = input_ids.shape

    # --- embeddings (gather stays in JAX glue) ---
    pos_mask = (input_ids != PAD_ID).astype(jnp.int32)
    position_ids = jnp.cumsum(pos_mask, axis=1) * pos_mask + PAD_ID   # RoBERTa-style positions
    emb = (params["word_emb"][input_ids]
           + params["pos_emb"][position_ids]
           + params["type_emb"][0])
    x = emb.astype(jnp.float32)                                       # (B, S, H)

    # --- per-batch additive key-padding bias (B, 1, S): broadcast inside the kernel ---
    bias = jnp.where(attention_mask > 0, 0.0, -1e9).astype(jnp.float32).reshape(B, 1, S)

    # --- fold the 1/sqrt(head_dim) attention scale into the Q slab of qkv_w / qkv_b ---
    scale = 1.0 / (HEAD_DIM ** 0.5)
    q_scale = jnp.concatenate(
        [jnp.full((1, HIDDEN), scale, jnp.float32),
         jnp.ones((1, 2 * HIDDEN), jnp.float32)], axis=1)             # (1, 3H)
    qkv_w = (params["qkv_w"] * q_scale).astype(jnp.bfloat16)          # (L, H, 3H) bf16
    qkv_b = params["qkv_b"] * q_scale                                 # (L, 1, 3H) f32

    # --- bf16 MXU operands (f32 accumulate in-kernel); LN/bias params stay f32 ---
    o_w = params["o_w"].astype(jnp.bfloat16)
    ff1_w = params["ff1_w"].astype(jnp.bfloat16)
    ff2_w = params["ff2_w"].astype(jnp.bfloat16)
    cls_w_pad = (jnp.zeros((HIDDEN, LANE), jnp.float32)
                 .at[:, :NUM_LABELS].set(params["cls_w"]).astype(jnp.bfloat16))
    cls_b_pad = jnp.zeros((1, LANE), jnp.float32).at[0, :NUM_LABELS].set(params["cls_b"])

    weight_args = (
        params["emb_ln_g"], params["emb_ln_b"],
        qkv_w, qkv_b, o_w, params["o_b"],
        params["ln1_g"], params["ln1_b"],
        ff1_w, params["ff1_b"], ff2_w, params["ff2_b"],
        params["ln2_g"], params["ln2_b"],
        cls_w_pad, cls_b_pad,
    )
    args = (x, bias) + weight_args

    in_specs = [
        pl.BlockSpec((None, S, HIDDEN), lambda b: (b, 0, 0)),   # per-batch token block
        pl.BlockSpec((None, 1, S), lambda b: (b, 0, 0)),        # per-batch key bias
    ] + [_replicated_spec(w) for w in weight_args]              # VMEM-resident weights

    kern = functools.partial(
        _encoder_classifier_kernel,
        n_heads=N_HEADS, head_dim=HEAD_DIM, n_layers=N_LAYERS, eps=LN_EPS)

    # One grid step per batch element, marked parallel (dual-TC sharding on v7x).
    out = pl.pallas_call(
        kern,
        out_shape=jax.ShapeDtypeStruct((B, OUT_SUBLANES, LANE), jnp.float32),
        grid=(B,),
        in_specs=in_specs,
        out_specs=pl.BlockSpec((None, OUT_SUBLANES, LANE), lambda b: (b, 0, 0)),
        compiler_params=pltpu.CompilerParams(dimension_semantics=("parallel",)),
    )(*args)

    return out[:, 0, :NUM_LABELS]


# ------------------------------- deterministic init --------------------------------
def init_params(key):
    keys = iter(jax.random.split(key, 64))

    def dense(shape):
        return jax.random.normal(next(keys), shape, jnp.float32) * 0.02

    def zeros(shape):
        return jnp.zeros(shape, jnp.float32)

    def ones(shape):
        return jnp.ones(shape, jnp.float32)

    L, H, I = N_LAYERS, HIDDEN, INTERMEDIATE
    return {
        "word_emb": dense((VOCAB, H)),
        "pos_emb": dense((MAX_POS, H)),
        "type_emb": dense((1, H)),
        "emb_ln_g": ones((1, H)), "emb_ln_b": zeros((1, H)),
        # per-layer weights stacked along a leading layer axis (VMEM-resident)
        "qkv_w": dense((L, H, 3 * H)), "qkv_b": zeros((L, 1, 3 * H)),
        "o_w": dense((L, H, H)), "o_b": zeros((L, 1, H)),
        "ln1_g": ones((L, 1, H)), "ln1_b": zeros((L, 1, H)),
        "ff1_w": dense((L, H, I)), "ff1_b": zeros((L, 1, I)),
        "ff2_w": dense((L, I, H)), "ff2_b": zeros((L, 1, H)),
        "ln2_g": ones((L, 1, H)), "ln2_b": zeros((L, 1, H)),
        "cls_w": dense((H, NUM_LABELS)),
        "cls_b": zeros((NUM_LABELS,)),
    }


# -------------------------------------- main ---------------------------------------
if __name__ == "__main__":
    B, S = 2, 8
    key = jax.random.PRNGKey(0)
    k_param, k_ids = jax.random.split(key)

    params = init_params(k_param)
    input_ids = jax.random.randint(k_ids, (B, S), minval=2, maxval=VOCAB, dtype=jnp.int32)
    input_ids = input_ids.at[:, 0].set(0)                      # <s> / CLS token
    attention_mask = jnp.ones((B, S), dtype=jnp.int32)
    attention_mask = attention_mask.at[1, S - 2:].set(0)       # pad tail of sequence 1
    input_ids = jnp.where(attention_mask == 1, input_ids, PAD_ID)

    logits = jax.jit(custom_model_forward)(params, input_ids, attention_mask)
    jax.block_until_ready(logits)
    assert logits.shape == (B, NUM_LABELS) and logits.dtype == jnp.float32
    print("KERNEL_OK")
</pallas_src>

<mosaic_0001>
module attributes {stable_mosaic.version = 11 : i64} {
  func.func @_encoder_classifier_kernel(%arg0: i32, %arg1: memref<1x8x32xf32, #tpu.memory_space<vmem>>, %arg2: memref<1x1x8xf32, #tpu.memory_space<vmem>>, %arg3: memref<1x32xf32, #tpu.memory_space<vmem>>, %arg4: memref<1x32xf32, #tpu.memory_space<vmem>>, %arg5: memref<2x32x96xbf16, #tpu.memory_space<vmem>>, %arg6: memref<2x1x96xf32, #tpu.memory_space<vmem>>, %arg7: memref<2x32x32xbf16, #tpu.memory_space<vmem>>, %arg8: memref<2x1x32xf32, #tpu.memory_space<vmem>>, %arg9: memref<2x1x32xf32, #tpu.memory_space<vmem>>, %arg10: memref<2x1x32xf32, #tpu.memory_space<vmem>>, %arg11: memref<2x32x64xbf16, #tpu.memory_space<vmem>>, %arg12: memref<2x1x64xf32, #tpu.memory_space<vmem>>, %arg13: memref<2x64x32xbf16, #tpu.memory_space<vmem>>, %arg14: memref<2x1x32xf32, #tpu.memory_space<vmem>>, %arg15: memref<2x1x32xf32, #tpu.memory_space<vmem>>, %arg16: memref<2x1x32xf32, #tpu.memory_space<vmem>>, %arg17: memref<32x128xbf16, #tpu.memory_space<vmem>>, %arg18: memref<1x128xf32, #tpu.memory_space<vmem>>, %arg19: memref<1x8x128xf32, #tpu.memory_space<vmem>>) attributes {dimension_semantics = [#tpu.dimension_semantics<parallel>], iteration_bounds = array<i64: 2>, scalar_prefetch = 0 : i64, scratch_operands = 0 : i64, tpu.core_type = #tpu.core_type<tc>, window_params = [{transform_indices = @transform_0, window_bounds = array<i64: 1, 8, 32>}, {transform_indices = @transform_1, window_bounds = array<i64: 1, 1, 8>}, {pipeline_mode = #tpu.pipeline_mode<synchronous>, transform_indices = @transform_2, window_bounds = array<i64: 1, 32>}, {pipeline_mode = #tpu.pipeline_mode<synchronous>, transform_indices = @transform_3, window_bounds = array<i64: 1, 32>}, {pipeline_mode = #tpu.pipeline_mode<synchronous>, transform_indices = @transform_4, window_bounds = array<i64: 2, 32, 96>}, {pipeline_mode = #tpu.pipeline_mode<synchronous>, transform_indices = @transform_5, window_bounds = array<i64: 2, 1, 96>}, {pipeline_mode = #tpu.pipeline_mode<synchronous>, transform_indices = @transform_6, window_bounds = array<i64: 2, 32, 32>}, {pipeline_mode = #tpu.pipeline_mode<synchronous>, transform_indices = @transform_7, window_bounds = array<i64: 2, 1, 32>}, {pipeline_mode = #tpu.pipeline_mode<synchronous>, transform_indices = @transform_8, window_bounds = array<i64: 2, 1, 32>}, {pipeline_mode = #tpu.pipeline_mode<synchronous>, transform_indices = @transform_9, window_bounds = array<i64: 2, 1, 32>}, {pipeline_mode = #tpu.pipeline_mode<synchronous>, transform_indices = @transform_10, window_bounds = array<i64: 2, 32, 64>}, {pipeline_mode = #tpu.pipeline_mode<synchronous>, transform_indices = @transform_11, window_bounds = array<i64: 2, 1, 64>}, {pipeline_mode = #tpu.pipeline_mode<synchronous>, transform_indices = @transform_12, window_bounds = array<i64: 2, 64, 32>}, {pipeline_mode = #tpu.pipeline_mode<synchronous>, transform_indices = @transform_13, window_bounds = array<i64: 2, 1, 32>}, {pipeline_mode = #tpu.pipeline_mode<synchronous>, transform_indices = @transform_14, window_bounds = array<i64: 2, 1, 32>}, {pipeline_mode = #tpu.pipeline_mode<synchronous>, transform_indices = @transform_15, window_bounds = array<i64: 2, 1, 32>}, {pipeline_mode = #tpu.pipeline_mode<synchronous>, transform_indices = @transform_16, window_bounds = array<i64: 32, 128>}, {pipeline_mode = #tpu.pipeline_mode<synchronous>, transform_indices = @transform_17, window_bounds = array<i64: 1, 128>}, {transform_indices = @transform_18, window_bounds = array<i64: 1, 8, 128>}]} {
    %c0 = arith.constant 0 : index
    %c0_0 = arith.constant 0 : index
    %c0_1 = arith.constant 0 : index
    %0 = vector.load %arg1[%c0, %c0_0, %c0_1] : memref<1x8x32xf32, #tpu.memory_space<vmem>>, vector<1x8x32xf32>
    %1 = vector.shape_cast %0 : vector<1x8x32xf32> to vector<8x32xf32>
    %c0_2 = arith.constant 0 : index
    %c0_3 = arith.constant 0 : index
    %2 = vector.load %arg3[%c0_2, %c0_3] : memref<1x32xf32, #tpu.memory_space<vmem>>, vector<1x32xf32>
    %c0_4 = arith.constant 0 : index
    %c0_5 = arith.constant 0 : index
    %3 = vector.load %arg4[%c0_4, %c0_5] : memref<1x32xf32, #tpu.memory_space<vmem>>, vector<1x32xf32>
    %cst = arith.constant dense<0.000000e+00> : vector<8xf32>
    %4 = vector.multi_reduction <add>, %1, %cst [1] : vector<8x32xf32> to vector<8xf32>
    %5 = vector.shape_cast %4 : vector<8xf32> to vector<8x1xf32>
    %cst_6 = arith.constant 3.200000e+01 : f32
    %6 = vector.broadcast %cst_6 : f32 to vector<8x1xf32>
    %7 = arith.divf %5, %6 : vector<8x1xf32>
    %8 = arith.mulf %1, %1 : vector<8x32xf32>
    %cst_7 = arith.constant dense<0.000000e+00> : vector<8xf32>
    %9 = vector.multi_reduction <add>, %8, %cst_7 [1] : vector<8x32xf32> to vector<8xf32>
    %10 = vector.shape_cast %9 : vector<8xf32> to vector<8x1xf32>
    %cst_8 = arith.constant 3.200000e+01 : f32
    %11 = vector.broadcast %cst_8 : f32 to vector<8x1xf32>
    %12 = arith.divf %10, %11 : vector<8x1xf32>
    %13 = arith.mulf %7, %7 : vector<8x1xf32>
    %14 = arith.subf %12, %13 : vector<8x1xf32>
    %15 = vector.broadcast %7 : vector<8x1xf32> to vector<8x32xf32>
    %16 = arith.subf %1, %15 : vector<8x32xf32>
    %cst_9 = arith.constant 9.99999974E-6 : f32
    %17 = vector.broadcast %cst_9 : f32 to vector<8x1xf32>
    %18 = arith.addf %14, %17 : vector<8x1xf32>
    %19 = math.rsqrt %18 : vector<8x1xf32>
    %20 = vector.broadcast %19 : vector<8x1xf32> to vector<8x32xf32>
    %21 = arith.mulf %16, %20 : vector<8x32xf32>
    %22 = vector.broadcast %2 : vector<1x32xf32> to vector<8x32xf32>
    %23 = arith.mulf %21, %22 : vector<8x32xf32>
    %24 = vector.broadcast %3 : vector<1x32xf32> to vector<8x32xf32>
    %25 = arith.addf %23, %24 : vector<8x32xf32>
    %c0_10 = arith.constant 0 : index
    %c0_11 = arith.constant 0 : index
    %c0_12 = arith.constant 0 : index
    %26 = vector.load %arg2[%c0_10, %c0_11, %c0_12] : memref<1x1x8xf32, #tpu.memory_space<vmem>>, vector<1x1x8xf32>
    %27 = vector.shape_cast %26 : vector<1x1x8xf32> to vector<1x8xf32>
    %28 = arith.truncf %25 : vector<8x32xf32> to vector<8x32xbf16>
    %c0_13 = arith.constant 0 : index
    %c0_14 = arith.constant 0 : index
    %c0_15 = arith.constant 0 : index
    %29 = vector.load %arg5[%c0_13, %c0_14, %c0_15] : memref<2x32x96xbf16, #tpu.memory_space<vmem>>, vector<1x32x96xbf16>
    %30 = vector.shape_cast %29 : vector<1x32x96xbf16> to vector<32x96xbf16>
    %cst_16 = arith.constant dense<0.000000e+00> : vector<8x96xf32>
    %31 = tpu.matmul %28, %30, %cst_16 {dimension_numbers = #tpu.dot_dimension_numbers<[1], [0], [0], [1], [0, 0, 1, 1], [], []>} : vector<8x32xbf16>, vector<32x96xbf16>, vector<8x96xf32> -> vector<8x96xf32>
    %c0_17 = arith.constant 0 : index
    %c0_18 = arith.constant 0 : index
    %c0_19 = arith.constant 0 : index
    %32 = vector.load %arg6[%c0_17, %c0_18, %c0_19] : memref<2x1x96xf32, #tpu.memory_space<vmem>>, vector<1x1x96xf32>
    %33 = vector.shape_cast %32 : vector<1x1x96xf32> to vector<1x96xf32>
    %34 = vector.broadcast %33 : vector<1x96xf32> to vector<8x96xf32>
    %35 = arith.addf %31, %34 : vector<8x96xf32>
    %36 = vector.extract_strided_slice %35 {offsets = [0, 0], sizes = [8, 32], strides = [1, 1]} : vector<8x96xf32> to vector<8x32xf32>
    %37 = arith.truncf %36 : vector<8x32xf32> to vector<8x32xbf16>
    %38 = vector.extract_strided_slice %35 {offsets = [0, 32], sizes = [8, 32], strides = [1, 1]} : vector<8x96xf32> to vector<8x32xf32>
    %39 = arith.truncf %38 : vector<8x32xf32> to vector<8x32xbf16>
    %40 = vector.extract_strided_slice %35 {offsets = [0, 64], sizes = [8, 32], strides = [1, 1]} : vector<8x96xf32> to vector<8x32xf32>
    %41 = arith.truncf %40 : vector<8x32xf32> to vector<8x32xbf16>
    %42 = vector.extract_strided_slice %37 {offsets = [0, 0], sizes = [8, 8], strides = [1, 1]} : vector<8x32xbf16> to vector<8x8xbf16>
    %43 = vector.extract_strided_slice %39 {offsets = [0, 0], sizes = [8, 8], strides = [1, 1]} : vector<8x32xbf16> to vector<8x8xbf16>
    %cst_20 = arith.constant dense<0.000000e+00> : vector<8x8xf32>
    %44 = tpu.matmul %42, %43, %cst_20 {dimension_numbers = #tpu.dot_dimension_numbers<[1], [1], [0], [0], [0, 0, 1, 0], [], []>} : vector<8x8xbf16>, vector<8x8xbf16>, vector<8x8xf32> -> vector<8x8xf32>
    %45 = vector.extract_strided_slice %37 {offsets = [0, 8], sizes = [8, 8], strides = [1, 1]} : vector<8x32xbf16> to vector<8x8xbf16>
    %46 = vector.extract_strided_slice %39 {offsets = [0, 8], sizes = [8, 8], strides = [1, 1]} : vector<8x32xbf16> to vector<8x8xbf16>
    %cst_21 = arith.constant dense<0.000000e+00> : vector<8x8xf32>
    %47 = tpu.matmul %45, %46, %cst_21 {dimension_numbers = #tpu.dot_dimension_numbers<[1], [1], [0], [0], [0, 0, 1, 0], [], []>} : vector<8x8xbf16>, vector<8x8xbf16>, vector<8x8xf32> -> vector<8x8xf32>
    %48 = vector.extract_strided_slice %37 {offsets = [0, 16], sizes = [8, 8], strides = [1, 1]} : vector<8x32xbf16> to vector<8x8xbf16>
    %49 = vector.extract_strided_slice %39 {offsets = [0, 16], sizes = [8, 8], strides = [1, 1]} : vector<8x32xbf16> to vector<8x8xbf16>
    %cst_22 = arith.constant dense<0.000000e+00> : vector<8x8xf32>
    %50 = tpu.matmul %48, %49, %cst_22 {dimension_numbers = #tpu.dot_dimension_numbers<[1], [1], [0], [0], [0, 0, 1, 0], [], []>} : vector<8x8xbf16>, vector<8x8xbf16>, vector<8x8xf32> -> vector<8x8xf32>
    %51 = vector.extract_strided_slice %37 {offsets = [0, 24], sizes = [8, 8], strides = [1, 1]} : vector<8x32xbf16> to vector<8x8xbf16>
    %52 = vector.extract_strided_slice %39 {offsets = [0, 24], sizes = [8, 8], strides = [1, 1]} : vector<8x32xbf16> to vector<8x8xbf16>
    %cst_23 = arith.constant dense<0.000000e+00> : vector<8x8xf32>
    %53 = tpu.matmul %51, %52, %cst_23 {dimension_numbers = #tpu.dot_dimension_numbers<[1], [1], [0], [0], [0, 0, 1, 0], [], []>} : vector<8x8xbf16>, vector<8x8xbf16>, vector<8x8xf32> -> vector<8x8xf32>
    %54 = tpu.concatenate %44, %47, %50, %53 in 0 : vector<8x8xf32>, vector<8x8xf32>, vector<8x8xf32>, vector<8x8xf32> -> vector<32x8xf32>
    %55 = vector.broadcast %27 : vector<1x8xf32> to vector<32x8xf32>
    %56 = arith.addf %54, %55 : vector<32x8xf32>
    %cst_24 = arith.constant dense<0xFF800000> : vector<32xf32>
    %57 = vector.multi_reduction <maximumf>, %56, %cst_24 [1] : vector<32x8xf32> to vector<32xf32>
    %58 = vector.shape_cast %57 : vector<32xf32> to vector<32x1xf32>
    %59 = vector.broadcast %58 : vector<32x1xf32> to vector<32x8xf32>
    %60 = arith.subf %56, %59 : vector<32x8xf32>
    %61 = math.exp %60 : vector<32x8xf32>
    %cst_25 = arith.constant dense<0.000000e+00> : vector<32xf32>
    %62 = vector.multi_reduction <add>, %61, %cst_25 [1] : vector<32x8xf32> to vector<32xf32>
    %63 = vector.shape_cast %62 : vector<32xf32> to vector<32x1xf32>
    %64 = tpu.reciprocal %63 {approx = true} : vector<32x1xf32> -> vector<32x1xf32>
    %65 = vector.broadcast %64 : vector<32x1xf32> to vector<32x8xf32>
    %66 = arith.mulf %61, %65 : vector<32x8xf32>
    %67 = arith.truncf %66 : vector<32x8xf32> to vector<32x8xbf16>
    %c0_26 = arith.constant 0 : index
    %c0_27 = arith.constant 0 : index
    %c0_28 = arith.constant 0 : index
    %68 = vector.load %arg7[%c0_26, %c0_27, %c0_28] : memref<2x32x32xbf16, #tpu.memory_space<vmem>>, vector<1x32x32xbf16>
    %69 = vector.shape_cast %68 : vector<1x32x32xbf16> to vector<32x32xbf16>
    %cst_29 = arith.constant 0.000000e+00 : f32
    %70 = vector.broadcast %cst_29 : f32 to vector<8x32xf32>
    %71 = vector.extract_strided_slice %67 {offsets = [0, 0], sizes = [8, 8], strides = [1, 1]} : vector<32x8xbf16> to vector<8x8xbf16>
    %72 = vector.extract_strided_slice %41 {offsets = [0, 0], sizes = [8, 8], strides = [1, 1]} : vector<8x32xbf16> to vector<8x8xbf16>
    %cst_30 = arith.constant dense<0.000000e+00> : vector<8x8xf32>
    %73 = tpu.matmul %71, %72, %cst_30 {dimension_numbers = #tpu.dot_dimension_numbers<[1], [0], [0], [1], [0, 0, 1, 1], [], []>} : vector<8x8xbf16>, vector<8x8xbf16>, vector<8x8xf32> -> vector<8x8xf32>
    %74 = arith.truncf %73 : vector<8x8xf32> to vector<8x8xbf16>
    %75 = vector.extract_strided_slice %69 {offsets = [0, 0], sizes = [8, 32], strides = [1, 1]} : vector<32x32xbf16> to vector<8x32xbf16>
    %cst_31 = arith.constant dense<0.000000e+00> : vector<8x32xf32>
    %76 = tpu.matmul %74, %75, %cst_31 {dimension_numbers = #tpu.dot_dimension_numbers<[1], [0], [0], [1], [0, 0, 1, 1], [], []>} : vector<8x8xbf16>, vector<8x32xbf16>, vector<8x32xf32> -> vector<8x32xf32>
    %77 = arith.addf %70, %76 : vector<8x32xf32>
    %78 = vector.extract_strided_slice %67 {offsets = [8, 0], sizes = [8, 8], strides = [1, 1]} : vector<32x8xbf16> to vector<8x8xbf16>
    %79 = vector.extract_strided_slice %41 {offsets = [0, 8], sizes = [8, 8], strides = [1, 1]} : vector<8x32xbf16> to vector<8x8xbf16>
    %cst_32 = arith.constant dense<0.000000e+00> : vector<8x8xf32>
    %80 = tpu.matmul %78, %79, %cst_32 {dimension_numbers = #tpu.dot_dimension_numbers<[1], [0], [0], [1], [0, 0, 1, 1], [], []>} : vector<8x8xbf16>, vector<8x8xbf16>, vector<8x8xf32> -> vector<8x8xf32>
    %81 = arith.truncf %80 : vector<8x8xf32> to vector<8x8xbf16>
    %82 = vector.extract_strided_slice %69 {offsets = [8, 0], sizes = [8, 32], strides = [1, 1]} : vector<32x32xbf16> to vector<8x32xbf16>
    %cst_33 = arith.constant dense<0.000000e+00> : vector<8x32xf32>
    %83 = tpu.matmul %81, %82, %cst_33 {dimension_numbers = #tpu.dot_dimension_numbers<[1], [0], [0], [1], [0, 0, 1, 1], [], []>} : vector<8x8xbf16>, vector<8x32xbf16>, vector<8x32xf32> -> vector<8x32xf32>
    %84 = arith.addf %77, %83 : vector<8x32xf32>
    %85 = vector.extract_strided_slice %67 {offsets = [16, 0], sizes = [8, 8], strides = [1, 1]} : vector<32x8xbf16> to vector<8x8xbf16>
    %86 = vector.extract_strided_slice %41 {offsets = [0, 16], sizes = [8, 8], strides = [1, 1]} : vector<8x32xbf16> to vector<8x8xbf16>
    %cst_34 = arith.constant dense<0.000000e+00> : vector<8x8xf32>
    %87 = tpu.matmul %85, %86, %cst_34 {dimension_numbers = #tpu.dot_dimension_numbers<[1], [0], [0], [1], [0, 0, 1, 1], [], []>} : vector<8x8xbf16>, vector<8x8xbf16>, vector<8x8xf32> -> vector<8x8xf32>
    %88 = arith.truncf %87 : vector<8x8xf32> to vector<8x8xbf16>
    %89 = vector.extract_strided_slice %69 {offsets = [16, 0], sizes = [8, 32], strides = [1, 1]} : vector<32x32xbf16> to vector<8x32xbf16>
    %cst_35 = arith.constant dense<0.000000e+00> : vector<8x32xf32>
    %90 = tpu.matmul %88, %89, %cst_35 {dimension_numbers = #tpu.dot_dimension_numbers<[1], [0], [0], [1], [0, 0, 1, 1], [], []>} : vector<8x8xbf16>, vector<8x32xbf16>, vector<8x32xf32> -> vector<8x32xf32>
    %91 = arith.addf %84, %90 : vector<8x32xf32>
    %92 = vector.extract_strided_slice %67 {offsets = [24, 0], sizes = [8, 8], strides = [1, 1]} : vector<32x8xbf16> to vector<8x8xbf16>
    %93 = vector.extract_strided_slice %41 {offsets = [0, 24], sizes = [8, 8], strides = [1, 1]} : vector<8x32xbf16> to vector<8x8xbf16>
    %cst_36 = arith.constant dense<0.000000e+00> : vector<8x8xf32>
    %94 = tpu.matmul %92, %93, %cst_36 {dimension_numbers = #tpu.dot_dimension_numbers<[1], [0], [0], [1], [0, 0, 1, 1], [], []>} : vector<8x8xbf16>, vector<8x8xbf16>, vector<8x8xf32> -> vector<8x8xf32>
    %95 = arith.truncf %94 : vector<8x8xf32> to vector<8x8xbf16>
    %96 = vector.extract_strided_slice %69 {offsets = [24, 0], sizes = [8, 32], strides = [1, 1]} : vector<32x32xbf16> to vector<8x32xbf16>
    %cst_37 = arith.constant dense<0.000000e+00> : vector<8x32xf32>
    %97 = tpu.matmul %95, %96, %cst_37 {dimension_numbers = #tpu.dot_dimension_numbers<[1], [0], [0], [1], [0, 0, 1, 1], [], []>} : vector<8x8xbf16>, vector<8x32xbf16>, vector<8x32xf32> -> vector<8x32xf32>
    %98 = arith.addf %91, %97 : vector<8x32xf32>
    %c0_38 = arith.constant 0 : index
    %c0_39 = arith.constant 0 : index
    %c0_40 = arith.constant 0 : index
    %99 = vector.load %arg8[%c0_38, %c0_39, %c0_40] : memref<2x1x32xf32, #tpu.memory_space<vmem>>, vector<1x1x32xf32>
    %100 = vector.shape_cast %99 : vector<1x1x32xf32> to vector<1x32xf32>
    %101 = vector.broadcast %100 : vector<1x32xf32> to vector<8x32xf32>
    %102 = arith.addf %98, %101 : vector<8x32xf32>
    %103 = arith.addf %102, %25 : vector<8x32xf32>
    %c0_41 = arith.constant 0 : index
    %c0_42 = arith.constant 0 : index
    %c0_43 = arith.constant 0 : index
    %104 = vector.load %arg9[%c0_41, %c0_42, %c0_43] : memref<2x1x32xf32, #tpu.memory_space<vmem>>, vector<1x1x32xf32>
    %105 = vector.shape_cast %104 : vector<1x1x32xf32> to vector<1x32xf32>
    %c0_44 = arith.constant 0 : index
    %c0_45 = arith.constant 0 : index
    %c0_46 = arith.constant 0 : index
    %106 = vector.load %arg10[%c0_44, %c0_45, %c0_46] : memref<2x1x32xf32, #tpu.memory_space<vmem>>, vector<1x1x32xf32>
    %107 = vector.shape_cast %106 : vector<1x1x32xf32> to vector<1x32xf32>
    %cst_47 = arith.constant dense<0.000000e+00> : vector<8xf32>
    %108 = vector.multi_reduction <add>, %103, %cst_47 [1] : vector<8x32xf32> to vector<8xf32>
    %109 = vector.shape_cast %108 : vector<8xf32> to vector<8x1xf32>
    %cst_48 = arith.constant 3.200000e+01 : f32
    %110 = vector.broadcast %cst_48 : f32 to vector<8x1xf32>
    %111 = arith.divf %109, %110 : vector<8x1xf32>
    %112 = arith.mulf %103, %103 : vector<8x32xf32>
    %cst_49 = arith.constant dense<0.000000e+00> : vector<8xf32>
    %113 = vector.multi_reduction <add>, %112, %cst_49 [1] : vector<8x32xf32> to vector<8xf32>
    %114 = vector.shape_cast %113 : vector<8xf32> to vector<8x1xf32>
    %cst_50 = arith.constant 3.200000e+01 : f32
    %115 = vector.broadcast %cst_50 : f32 to vector<8x1xf32>
    %116 = arith.divf %114, %115 : vector<8x1xf32>
    %117 = arith.mulf %111, %111 : vector<8x1xf32>
    %118 = arith.subf %116, %117 : vector<8x1xf32>
    %119 = vector.broadcast %111 : vector<8x1xf32> to vector<8x32xf32>
    %120 = arith.subf %103, %119 : vector<8x32xf32>
    %cst_51 = arith.constant 9.99999974E-6 : f32
    %121 = vector.broadcast %cst_51 : f32 to vector<8x1xf32>
    %122 = arith.addf %118, %121 : vector<8x1xf32>
    %123 = math.rsqrt %122 : vector<8x1xf32>
    %124 = vector.broadcast %123 : vector<8x1xf32> to vector<8x32xf32>
    %125 = arith.mulf %120, %124 : vector<8x32xf32>
    %126 = vector.broadcast %105 : vector<1x32xf32> to vector<8x32xf32>
    %127 = arith.mulf %125, %126 : vector<8x32xf32>
    %128 = vector.broadcast %107 : vector<1x32xf32> to vector<8x32xf32>
    %129 = arith.addf %127, %128 : vector<8x32xf32>
    %130 = arith.truncf %129 : vector<8x32xf32> to vector<8x32xbf16>
    %c0_52 = arith.constant 0 : index
    %c0_53 = arith.constant 0 : index
    %c0_54 = arith.constant 0 : index
    %131 = vector.load %arg11[%c0_52, %c0_53, %c0_54] : memref<2x32x64xbf16, #tpu.memory_space<vmem>>, vector<1x32x64xbf16>
    %132 = vector.shape_cast %131 : vector<1x32x64xbf16> to vector<32x64xbf16>
    %cst_55 = arith.constant dense<0.000000e+00> : vector<8x64xf32>
    %133 = tpu.matmul %130, %132, %cst_55 {dimension_numbers = #tpu.dot_dimension_numbers<[1], [0], [0], [1], [0, 0, 1, 1], [], []>} : vector<8x32xbf16>, vector<32x64xbf16>, vector<8x64xf32> -> vector<8x64xf32>
    %c0_56 = arith.constant 0 : index
    %c0_57 = arith.constant 0 : index
    %c0_58 = arith.constant 0 : index
    %134 = vector.load %arg12[%c0_56, %c0_57, %c0_58] : memref<2x1x64xf32, #tpu.memory_space<vmem>>, vector<1x1x64xf32>
    %135 = vector.shape_cast %134 : vector<1x1x64xf32> to vector<1x64xf32>
    %136 = vector.broadcast %135 : vector<1x64xf32> to vector<8x64xf32>
    %137 = arith.addf %133, %136 : vector<8x64xf32>
    %138 = arith.mulf %137, %137 : vector<8x64xf32>
    %139 = arith.mulf %137, %138 : vector<8x64xf32>
    %cst_59 = arith.constant 4.471500e-02 : f32
    %140 = vector.broadcast %cst_59 : f32 to vector<8x64xf32>
    %141 = arith.mulf %140, %139 : vector<8x64xf32>
    %142 = arith.addf %137, %141 : vector<8x64xf32>
    %cst_60 = arith.constant 0.797884583 : f32
    %143 = vector.broadcast %cst_60 : f32 to vector<8x64xf32>
    %144 = arith.mulf %143, %142 : vector<8x64xf32>
    %145 = math.tanh %144 : vector<8x64xf32>
    %cst_61 = arith.constant 1.000000e+00 : f32
    %146 = vector.broadcast %cst_61 : f32 to vector<8x64xf32>
    %147 = arith.addf %146, %145 : vector<8x64xf32>
    %cst_62 = arith.constant 5.000000e-01 : f32
    %148 = vector.broadcast %cst_62 : f32 to vector<8x64xf32>
    %149 = arith.mulf %148, %147 : vector<8x64xf32>
    %150 = arith.mulf %137, %149 : vector<8x64xf32>
    %151 = arith.truncf %150 : vector<8x64xf32> to vector<8x64xbf16>
    %c0_63 = arith.constant 0 : index
    %c0_64 = arith.constant 0 : index
    %c0_65 = arith.constant 0 : index
    %152 = vector.load %arg13[%c0_63, %c0_64, %c0_65] : memref<2x64x32xbf16, #tpu.memory_space<vmem>>, vector<1x64x32xbf16>
    %153 = vector.shape_cast %152 : vector<1x64x32xbf16> to vector<64x32xbf16>
    %cst_66 = arith.constant dense<0.000000e+00> : vector<8x32xf32>
    %154 = tpu.matmul %151, %153, %cst_66 {dimension_numbers = #tpu.dot_dimension_numbers<[1], [0], [0], [1], [0, 0, 1, 1], [], []>} : vector<8x64xbf16>, vector<64x32xbf16>, vector<8x32xf32> -> vector<8x32xf32>
    %c0_67 = arith.constant 0 : index
    %c0_68 = arith.constant 0 : index
    %c0_69 = arith.constant 0 : index
    %155 = vector.load %arg14[%c0_67, %c0_68, %c0_69] : memref<2x1x32xf32, #tpu.memory_space<vmem>>, vector<1x1x32xf32>
    %156 = vector.shape_cast %155 : vector<1x1x32xf32> to vector<1x32xf32>
    %157 = vector.broadcast %156 : vector<1x32xf32> to vector<8x32xf32>
    %158 = arith.addf %154, %157 : vector<8x32xf32>
    %159 = arith.addf %158, %129 : vector<8x32xf32>
    %c0_70 = arith.constant 0 : index
    %c0_71 = arith.constant 0 : index
    %c0_72 = arith.constant 0 : index
    %160 = vector.load %arg15[%c0_70, %c0_71, %c0_72] : memref<2x1x32xf32, #tpu.memory_space<vmem>>, vector<1x1x32xf32>
    %161 = vector.shape_cast %160 : vector<1x1x32xf32> to vector<1x32xf32>
    %c0_73 = arith.constant 0 : index
    %c0_74 = arith.constant 0 : index
    %c0_75 = arith.constant 0 : index
    %162 = vector.load %arg16[%c0_73, %c0_74, %c0_75] : memref<2x1x32xf32, #tpu.memory_space<vmem>>, vector<1x1x32xf32>
    %163 = vector.shape_cast %162 : vector<1x1x32xf32> to vector<1x32xf32>
    %cst_76 = arith.constant dense<0.000000e+00> : vector<8xf32>
    %164 = vector.multi_reduction <add>, %159, %cst_76 [1] : vector<8x32xf32> to vector<8xf32>
    %165 = vector.shape_cast %164 : vector<8xf32> to vector<8x1xf32>
    %cst_77 = arith.constant 3.200000e+01 : f32
    %166 = vector.broadcast %cst_77 : f32 to vector<8x1xf32>
    %167 = arith.divf %165, %166 : vector<8x1xf32>
    %168 = arith.mulf %159, %159 : vector<8x32xf32>
    %cst_78 = arith.constant dense<0.000000e+00> : vector<8xf32>
    %169 = vector.multi_reduction <add>, %168, %cst_78 [1] : vector<8x32xf32> to vector<8xf32>
    %170 = vector.shape_cast %169 : vector<8xf32> to vector<8x1xf32>
    %cst_79 = arith.constant 3.200000e+01 : f32
    %171 = vector.broadcast %cst_79 : f32 to vector<8x1xf32>
    %172 = arith.divf %170, %171 : vector<8x1xf32>
    %173 = arith.mulf %167, %167 : vector<8x1xf32>
    %174 = arith.subf %172, %173 : vector<8x1xf32>
    %175 = vector.broadcast %167 : vector<8x1xf32> to vector<8x32xf32>
    %176 = arith.subf %159, %175 : vector<8x32xf32>
    %cst_80 = arith.constant 9.99999974E-6 : f32
    %177 = vector.broadcast %cst_80 : f32 to vector<8x1xf32>
    %178 = arith.addf %174, %177 : vector<8x1xf32>
    %179 = math.rsqrt %178 : vector<8x1xf32>
    %180 = vector.broadcast %179 : vector<8x1xf32> to vector<8x32xf32>
    %181 = arith.mulf %176, %180 : vector<8x32xf32>
    %182 = vector.broadcast %161 : vector<1x32xf32> to vector<8x32xf32>
    %183 = arith.mulf %181, %182 : vector<8x32xf32>
    %184 = vector.broadcast %163 : vector<1x32xf32> to vector<8x32xf32>
    %185 = arith.addf %183, %184 : vector<8x32xf32>
    %186 = arith.truncf %185 : vector<8x32xf32> to vector<8x32xbf16>
    %c1 = arith.constant 1 : index
    %c0_81 = arith.constant 0 : index
    %c0_82 = arith.constant 0 : index
    %187 = vector.load %arg5[%c1, %c0_81, %c0_82] : memref<2x32x96xbf16, #tpu.memory_space<vmem>>, vector<1x32x96xbf16>
    %188 = vector.shape_cast %187 : vector<1x32x96xbf16> to vector<32x96xbf16>
    %cst_83 = arith.constant dense<0.000000e+00> : vector<8x96xf32>
    %189 = tpu.matmul %186, %188, %cst_83 {dimension_numbers = #tpu.dot_dimension_numbers<[1], [0], [0], [1], [0, 0, 1, 1], [], []>} : vector<8x32xbf16>, vector<32x96xbf16>, vector<8x96xf32> -> vector<8x96xf32>
    %c1_84 = arith.constant 1 : index
    %c0_85 = arith.constant 0 : index
    %c0_86 = arith.constant 0 : index
    %190 = vector.load %arg6[%c1_84, %c0_85, %c0_86] : memref<2x1x96xf32, #tpu.memory_space<vmem>>, vector<1x1x96xf32>
    %191 = vector.shape_cast %190 : vector<1x1x96xf32> to vector<1x96xf32>
    %192 = vector.broadcast %191 : vector<1x96xf32> to vector<8x96xf32>
    %193 = arith.addf %189, %192 : vector<8x96xf32>
    %194 = vector.extract_strided_slice %193 {offsets = [0, 0], sizes = [8, 32], strides = [1, 1]} : vector<8x96xf32> to vector<8x32xf32>
    %195 = arith.truncf %194 : vector<8x32xf32> to vector<8x32xbf16>
    %196 = vector.extract_strided_slice %193 {offsets = [0, 32], sizes = [8, 32], strides = [1, 1]} : vector<8x96xf32> to vector<8x32xf32>
    %197 = arith.truncf %196 : vector<8x32xf32> to vector<8x32xbf16>
    %198 = vector.extract_strided_slice %193 {offsets = [0, 64], sizes = [8, 32], strides = [1, 1]} : vector<8x96xf32> to vector<8x32xf32>
    %199 = arith.truncf %198 : vector<8x32xf32> to vector<8x32xbf16>
    %200 = vector.extract_strided_slice %195 {offsets = [0, 0], sizes = [8, 8], strides = [1, 1]} : vector<8x32xbf16> to vector<8x8xbf16>
    %201 = vector.extract_strided_slice %197 {offsets = [0, 0], sizes = [8, 8], strides = [1, 1]} : vector<8x32xbf16> to vector<8x8xbf16>
    %cst_87 = arith.constant dense<0.000000e+00> : vector<8x8xf32>
    %202 = tpu.matmul %200, %201, %cst_87 {dimension_numbers = #tpu.dot_dimension_numbers<[1], [1], [0], [0], [0, 0, 1, 0], [], []>} : vector<8x8xbf16>, vector<8x8xbf16>, vector<8x8xf32> -> vector<8x8xf32>
    %203 = vector.extract_strided_slice %195 {offsets = [0, 8], sizes = [8, 8], strides = [1, 1]} : vector<8x32xbf16> to vector<8x8xbf16>
    %204 = vector.extract_strided_slice %197 {offsets = [0, 8], sizes = [8, 8], strides = [1, 1]} : vector<8x32xbf16> to vector<8x8xbf16>
    %cst_88 = arith.constant dense<0.000000e+00> : vector<8x8xf32>
    %205 = tpu.matmul %203, %204, %cst_88 {dimension_numbers = #tpu.dot_dimension_numbers<[1], [1], [0], [0], [0, 0, 1, 0], [], []>} : vector<8x8xbf16>, vector<8x8xbf16>, vector<8x8xf32> -> vector<8x8xf32>
    %206 = vector.extract_strided_slice %195 {offsets = [0, 16], sizes = [8, 8], strides = [1, 1]} : vector<8x32xbf16> to vector<8x8xbf16>
    %207 = vector.extract_strided_slice %197 {offsets = [0, 16], sizes = [8, 8], strides = [1, 1]} : vector<8x32xbf16> to vector<8x8xbf16>
    %cst_89 = arith.constant dense<0.000000e+00> : vector<8x8xf32>
    %208 = tpu.matmul %206, %207, %cst_89 {dimension_numbers = #tpu.dot_dimension_numbers<[1], [1], [0], [0], [0, 0, 1, 0], [], []>} : vector<8x8xbf16>, vector<8x8xbf16>, vector<8x8xf32> -> vector<8x8xf32>
    %209 = vector.extract_strided_slice %195 {offsets = [0, 24], sizes = [8, 8], strides = [1, 1]} : vector<8x32xbf16> to vector<8x8xbf16>
    %210 = vector.extract_strided_slice %197 {offsets = [0, 24], sizes = [8, 8], strides = [1, 1]} : vector<8x32xbf16> to vector<8x8xbf16>
    %cst_90 = arith.constant dense<0.000000e+00> : vector<8x8xf32>
    %211 = tpu.matmul %209, %210, %cst_90 {dimension_numbers = #tpu.dot_dimension_numbers<[1], [1], [0], [0], [0, 0, 1, 0], [], []>} : vector<8x8xbf16>, vector<8x8xbf16>, vector<8x8xf32> -> vector<8x8xf32>
    %212 = tpu.concatenate %202, %205, %208, %211 in 0 : vector<8x8xf32>, vector<8x8xf32>, vector<8x8xf32>, vector<8x8xf32> -> vector<32x8xf32>
    %213 = vector.broadcast %27 : vector<1x8xf32> to vector<32x8xf32>
    %214 = arith.addf %212, %213 : vector<32x8xf32>
    %cst_91 = arith.constant dense<0xFF800000> : vector<32xf32>
    %215 = vector.multi_reduction <maximumf>, %214, %cst_91 [1] : vector<32x8xf32> to vector<32xf32>
    %216 = vector.shape_cast %215 : vector<32xf32> to vector<32x1xf32>
    %217 = vector.broadcast %216 : vector<32x1xf32> to vector<32x8xf32>
    %218 = arith.subf %214, %217 : vector<32x8xf32>
    %219 = math.exp %218 : vector<32x8xf32>
    %cst_92 = arith.constant dense<0.000000e+00> : vector<32xf32>
    %220 = vector.multi_reduction <add>, %219, %cst_92 [1] : vector<32x8xf32> to vector<32xf32>
    %221 = vector.shape_cast %220 : vector<32xf32> to vector<32x1xf32>
    %222 = tpu.reciprocal %221 {approx = true} : vector<32x1xf32> -> vector<32x1xf32>
    %223 = vector.broadcast %222 : vector<32x1xf32> to vector<32x8xf32>
    %224 = arith.mulf %219, %223 : vector<32x8xf32>
    %225 = arith.truncf %224 : vector<32x8xf32> to vector<32x8xbf16>
    %c1_93 = arith.constant 1 : index
    %c0_94 = arith.constant 0 : index
    %c0_95 = arith.constant 0 : index
    %226 = vector.load %arg7[%c1_93, %c0_94, %c0_95] : memref<2x32x32xbf16, #tpu.memory_space<vmem>>, vector<1x32x32xbf16>
    %227 = vector.shape_cast %226 : vector<1x32x32xbf16> to vector<32x32xbf16>
    %cst_96 = arith.constant 0.000000e+00 : f32
    %228 = vector.broadcast %cst_96 : f32 to vector<8x32xf32>
    %229 = vector.extract_strided_slice %225 {offsets = [0, 0], sizes = [8, 8], strides = [1, 1]} : vector<32x8xbf16> to vector<8x8xbf16>
    %230 = vector.extract_strided_slice %199 {offsets = [0, 0], sizes = [8, 8], strides = [1, 1]} : vector<8x32xbf16> to vector<8x8xbf16>
    %cst_97 = arith.constant dense<0.000000e+00> : vector<8x8xf32>
    %231 = tpu.matmul %229, %230, %cst_97 {dimension_numbers = #tpu.dot_dimension_numbers<[1], [0], [0], [1], [0, 0, 1, 1], [], []>} : vector<8x8xbf16>, vector<8x8xbf16>, vector<8x8xf32> -> vector<8x8xf32>
    %232 = arith.truncf %231 : vector<8x8xf32> to vector<8x8xbf16>
    %233 = vector.extract_strided_slice %227 {offsets = [0, 0], sizes = [8, 32], strides = [1, 1]} : vector<32x32xbf16> to vector<8x32xbf16>
    %cst_98 = arith.constant dense<0.000000e+00> : vector<8x32xf32>
    %234 = tpu.matmul %232, %233, %cst_98 {dimension_numbers = #tpu.dot_dimension_numbers<[1], [0], [0], [1], [0, 0, 1, 1], [], []>} : vector<8x8xbf16>, vector<8x32xbf16>, vector<8x32xf32> -> vector<8x32xf32>
    %235 = arith.addf %228, %234 : vector<8x32xf32>
    %236 = vector.extract_strided_slice %225 {offsets = [8, 0], sizes = [8, 8], strides = [1, 1]} : vector<32x8xbf16> to vector<8x8xbf16>
    %237 = vector.extract_strided_slice %199 {offsets = [0, 8], sizes = [8, 8], strides = [1, 1]} : vector<8x32xbf16> to vector<8x8xbf16>
    %cst_99 = arith.constant dense<0.000000e+00> : vector<8x8xf32>
    %238 = tpu.matmul %236, %237, %cst_99 {dimension_numbers = #tpu.dot_dimension_numbers<[1], [0], [0], [1], [0, 0, 1, 1], [], []>} : vector<8x8xbf16>, vector<8x8xbf16>, vector<8x8xf32> -> vector<8x8xf32>
    %239 = arith.truncf %238 : vector<8x8xf32> to vector<8x8xbf16>
    %240 = vector.extract_strided_slice %227 {offsets = [8, 0], sizes = [8, 32], strides = [1, 1]} : vector<32x32xbf16> to vector<8x32xbf16>
    %cst_100 = arith.constant dense<0.000000e+00> : vector<8x32xf32>
    %241 = tpu.matmul %239, %240, %cst_100 {dimension_numbers = #tpu.dot_dimension_numbers<[1], [0], [0], [1], [0, 0, 1, 1], [], []>} : vector<8x8xbf16>, vector<8x32xbf16>, vector<8x32xf32> -> vector<8x32xf32>
    %242 = arith.addf %235, %241 : vector<8x32xf32>
    %243 = vector.extract_strided_slice %225 {offsets = [16, 0], sizes = [8, 8], strides = [1, 1]} : vector<32x8xbf16> to vector<8x8xbf16>
    %244 = vector.extract_strided_slice %199 {offsets = [0, 16], sizes = [8, 8], strides = [1, 1]} : vector<8x32xbf16> to vector<8x8xbf16>
    %cst_101 = arith.constant dense<0.000000e+00> : vector<8x8xf32>
    %245 = tpu.matmul %243, %244, %cst_101 {dimension_numbers = #tpu.dot_dimension_numbers<[1], [0], [0], [1], [0, 0, 1, 1], [], []>} : vector<8x8xbf16>, vector<8x8xbf16>, vector<8x8xf32> -> vector<8x8xf32>
    %246 = arith.truncf %245 : vector<8x8xf32> to vector<8x8xbf16>
    %247 = vector.extract_strided_slice %227 {offsets = [16, 0], sizes = [8, 32], strides = [1, 1]} : vector<32x32xbf16> to vector<8x32xbf16>
    %cst_102 = arith.constant dense<0.000000e+00> : vector<8x32xf32>
    %248 = tpu.matmul %246, %247, %cst_102 {dimension_numbers = #tpu.dot_dimension_numbers<[1], [0], [0], [1], [0, 0, 1, 1], [], []>} : vector<8x8xbf16>, vector<8x32xbf16>, vector<8x32xf32> -> vector<8x32xf32>
    %249 = arith.addf %242, %248 : vector<8x32xf32>
    %250 = vector.extract_strided_slice %225 {offsets = [24, 0], sizes = [8, 8], strides = [1, 1]} : vector<32x8xbf16> to vector<8x8xbf16>
    %251 = vector.extract_strided_slice %199 {offsets = [0, 24], sizes = [8, 8], strides = [1, 1]} : vector<8x32xbf16> to vector<8x8xbf16>
    %cst_103 = arith.constant dense<0.000000e+00> : vector<8x8xf32>
    %252 = tpu.matmul %250, %251, %cst_103 {dimension_numbers = #tpu.dot_dimension_numbers<[1], [0], [0], [1], [0, 0, 1, 1], [], []>} : vector<8x8xbf16>, vector<8x8xbf16>, vector<8x8xf32> -> vector<8x8xf32>
    %253 = arith.truncf %252 : vector<8x8xf32> to vector<8x8xbf16>
    %254 = vector.extract_strided_slice %227 {offsets = [24, 0], sizes = [8, 32], strides = [1, 1]} : vector<32x32xbf16> to vector<8x32xbf16>
    %cst_104 = arith.constant dense<0.000000e+00> : vector<8x32xf32>
    %255 = tpu.matmul %253, %254, %cst_104 {dimension_numbers = #tpu.dot_dimension_numbers<[1], [0], [0], [1], [0, 0, 1, 1], [], []>} : vector<8x8xbf16>, vector<8x32xbf16>, vector<8x32xf32> -> vector<8x32xf32>
    %256 = arith.addf %249, %255 : vector<8x32xf32>
    %c1_105 = arith.constant 1 : index
    %c0_106 = arith.constant 0 : index
    %c0_107 = arith.constant 0 : index
    %257 = vector.load %arg8[%c1_105, %c0_106, %c0_107] : memref<2x1x32xf32, #tpu.memory_space<vmem>>, vector<1x1x32xf32>
    %258 = vector.shape_cast %257 : vector<1x1x32xf32> to vector<1x32xf32>
    %259 = vector.broadcast %258 : vector<1x32xf32> to vector<8x32xf32>
    %260 = arith.addf %256, %259 : vector<8x32xf32>
    %261 = arith.addf %260, %185 : vector<8x32xf32>
    %c1_108 = arith.constant 1 : index
    %c0_109 = arith.constant 0 : index
    %c0_110 = arith.constant 0 : index
    %262 = vector.load %arg9[%c1_108, %c0_109, %c0_110] : memref<2x1x32xf32, #tpu.memory_space<vmem>>, vector<1x1x32xf32>
    %263 = vector.shape_cast %262 : vector<1x1x32xf32> to vector<1x32xf32>
    %c1_111 = arith.constant 1 : index
    %c0_112 = arith.constant 0 : index
    %c0_113 = arith.constant 0 : index
    %264 = vector.load %arg10[%c1_111, %c0_112, %c0_113] : memref<2x1x32xf32, #tpu.memory_space<vmem>>, vector<1x1x32xf32>
    %265 = vector.shape_cast %264 : vector<1x1x32xf32> to vector<1x32xf32>
    %cst_114 = arith.constant dense<0.000000e+00> : vector<8xf32>
    %266 = vector.multi_reduction <add>, %261, %cst_114 [1] : vector<8x32xf32> to vector<8xf32>
    %267 = vector.shape_cast %266 : vector<8xf32> to vector<8x1xf32>
    %cst_115 = arith.constant 3.200000e+01 : f32
    %268 = vector.broadcast %cst_115 : f32 to vector<8x1xf32>
    %269 = arith.divf %267, %268 : vector<8x1xf32>
    %270 = arith.mulf %261, %261 : vector<8x32xf32>
    %cst_116 = arith.constant dense<0.000000e+00> : vector<8xf32>
    %271 = vector.multi_reduction <add>, %270, %cst_116 [1] : vector<8x32xf32> to vector<8xf32>
    %272 = vector.shape_cast %271 : vector<8xf32> to vector<8x1xf32>
    %cst_117 = arith.constant 3.200000e+01 : f32
    %273 = vector.broadcast %cst_117 : f32 to vector<8x1xf32>
    %274 = arith.divf %272, %273 : vector<8x1xf32>
    %275 = arith.mulf %269, %269 : vector<8x1xf32>
    %276 = arith.subf %274, %275 : vector<8x1xf32>
    %277 = vector.broadcast %269 : vector<8x1xf32> to vector<8x32xf32>
    %278 = arith.subf %261, %277 : vector<8x32xf32>
    %cst_118 = arith.constant 9.99999974E-6 : f32
    %279 = vector.broadcast %cst_118 : f32 to vector<8x1xf32>
    %280 = arith.addf %276, %279 : vector<8x1xf32>
    %281 = math.rsqrt %280 : vector<8x1xf32>
    %282 = vector.broadcast %281 : vector<8x1xf32> to vector<8x32xf32>
    %283 = arith.mulf %278, %282 : vector<8x32xf32>
    %284 = vector.broadcast %263 : vector<1x32xf32> to vector<8x32xf32>
    %285 = arith.mulf %283, %284 : vector<8x32xf32>
    %286 = vector.broadcast %265 : vector<1x32xf32> to vector<8x32xf32>
    %287 = arith.addf %285, %286 : vector<8x32xf32>
    %288 = arith.truncf %287 : vector<8x32xf32> to vector<8x32xbf16>
    %c1_119 = arith.constant 1 : index
    %c0_120 = arith.constant 0 : index
    %c0_121 = arith.constant 0 : index
    %289 = vector.load %arg11[%c1_119, %c0_120, %c0_121] : memref<2x32x64xbf16, #tpu.memory_space<vmem>>, vector<1x32x64xbf16>
    %290 = vector.shape_cast %289 : vector<1x32x64xbf16> to vector<32x64xbf16>
    %cst_122 = arith.constant dense<0.000000e+00> : vector<8x64xf32>
    %291 = tpu.matmul %288, %290, %cst_122 {dimension_numbers = #tpu.dot_dimension_numbers<[1], [0], [0], [1], [0, 0, 1, 1], [], []>} : vector<8x32xbf16>, vector<32x64xbf16>, vector<8x64xf32> -> vector<8x64xf32>
    %c1_123 = arith.constant 1 : index
    %c0_124 = arith.constant 0 : index
    %c0_125 = arith.constant 0 : index
    %292 = vector.load %arg12[%c1_123, %c0_124, %c0_125] : memref<2x1x64xf32, #tpu.memory_space<vmem>>, vector<1x1x64xf32>
    %293 = vector.shape_cast %292 : vector<1x1x64xf32> to vector<1x64xf32>
    %294 = vector.broadcast %293 : vector<1x64xf32> to vector<8x64xf32>
    %295 = arith.addf %291, %294 : vector<8x64xf32>
    %296 = arith.mulf %295, %295 : vector<8x64xf32>
    %297 = arith.mulf %295, %296 : vector<8x64xf32>
    %cst_126 = arith.constant 4.471500e-02 : f32
    %298 = vector.broadcast %cst_126 : f32 to vector<8x64xf32>
    %299 = arith.mulf %298, %297 : vector<8x64xf32>
    %300 = arith.addf %295, %299 : vector<8x64xf32>
    %cst_127 = arith.constant 0.797884583 : f32
    %301 = vector.broadcast %cst_127 : f32 to vector<8x64xf32>
    %302 = arith.mulf %301, %300 : vector<8x64xf32>
    %303 = math.tanh %302 : vector<8x64xf32>
    %cst_128 = arith.constant 1.000000e+00 : f32
    %304 = vector.broadcast %cst_128 : f32 to vector<8x64xf32>
    %305 = arith.addf %304, %303 : vector<8x64xf32>
    %cst_129 = arith.constant 5.000000e-01 : f32
    %306 = vector.broadcast %cst_129 : f32 to vector<8x64xf32>
    %307 = arith.mulf %306, %305 : vector<8x64xf32>
    %308 = arith.mulf %295, %307 : vector<8x64xf32>
    %309 = arith.truncf %308 : vector<8x64xf32> to vector<8x64xbf16>
    %c1_130 = arith.constant 1 : index
    %c0_131 = arith.constant 0 : index
    %c0_132 = arith.constant 0 : index
    %310 = vector.load %arg13[%c1_130, %c0_131, %c0_132] : memref<2x64x32xbf16, #tpu.memory_space<vmem>>, vector<1x64x32xbf16>
    %311 = vector.shape_cast %310 : vector<1x64x32xbf16> to vector<64x32xbf16>
    %cst_133 = arith.constant dense<0.000000e+00> : vector<8x32xf32>
    %312 = tpu.matmul %309, %311, %cst_133 {dimension_numbers = #tpu.dot_dimension_numbers<[1], [0], [0], [1], [0, 0, 1, 1], [], []>} : vector<8x64xbf16>, vector<64x32xbf16>, vector<8x32xf32> -> vector<8x32xf32>
    %c1_134 = arith.constant 1 : index
    %c0_135 = arith.constant 0 : index
    %c0_136 = arith.constant 0 : index
    %313 = vector.load %arg14[%c1_134, %c0_135, %c0_136] : memref<2x1x32xf32, #tpu.memory_space<vmem>>, vector<1x1x32xf32>
    %314 = vector.shape_cast %313 : vector<1x1x32xf32> to vector<1x32xf32>
    %315 = vector.broadcast %314 : vector<1x32xf32> to vector<8x32xf32>
    %316 = arith.addf %312, %315 : vector<8x32xf32>
    %317 = arith.addf %316, %287 : vector<8x32xf32>
    %c1_137 = arith.constant 1 : index
    %c0_138 = arith.constant 0 : index
    %c0_139 = arith.constant 0 : index
    %318 = vector.load %arg15[%c1_137, %c0_138, %c0_139] : memref<2x1x32xf32, #tpu.memory_space<vmem>>, vector<1x1x32xf32>
    %319 = vector.shape_cast %318 : vector<1x1x32xf32> to vector<1x32xf32>
    %c1_140 = arith.constant 1 : index
    %c0_141 = arith.constant 0 : index
    %c0_142 = arith.constant 0 : index
    %320 = vector.load %arg16[%c1_140, %c0_141, %c0_142] : memref<2x1x32xf32, #tpu.memory_space<vmem>>, vector<1x1x32xf32>
    %321 = vector.shape_cast %320 : vector<1x1x32xf32> to vector<1x32xf32>
    %cst_143 = arith.constant dense<0.000000e+00> : vector<8xf32>
    %322 = vector.multi_reduction <add>, %317, %cst_143 [1] : vector<8x32xf32> to vector<8xf32>
    %323 = vector.shape_cast %322 : vector<8xf32> to vector<8x1xf32>
    %cst_144 = arith.constant 3.200000e+01 : f32
    %324 = vector.broadcast %cst_144 : f32 to vector<8x1xf32>
    %325 = arith.divf %323, %324 : vector<8x1xf32>
    %326 = arith.mulf %317, %317 : vector<8x32xf32>
    %cst_145 = arith.constant dense<0.000000e+00> : vector<8xf32>
    %327 = vector.multi_reduction <add>, %326, %cst_145 [1] : vector<8x32xf32> to vector<8xf32>
    %328 = vector.shape_cast %327 : vector<8xf32> to vector<8x1xf32>
    %cst_146 = arith.constant 3.200000e+01 : f32
    %329 = vector.broadcast %cst_146 : f32 to vector<8x1xf32>
    %330 = arith.divf %328, %329 : vector<8x1xf32>
    %331 = arith.mulf %325, %325 : vector<8x1xf32>
    %332 = arith.subf %330, %331 : vector<8x1xf32>
    %333 = vector.broadcast %325 : vector<8x1xf32> to vector<8x32xf32>
    %334 = arith.subf %317, %333 : vector<8x32xf32>
    %cst_147 = arith.constant 9.99999974E-6 : f32
    %335 = vector.broadcast %cst_147 : f32 to vector<8x1xf32>
    %336 = arith.addf %332, %335 : vector<8x1xf32>
    %337 = math.rsqrt %336 : vector<8x1xf32>
    %338 = vector.broadcast %337 : vector<8x1xf32> to vector<8x32xf32>
    %339 = arith.mulf %334, %338 : vector<8x32xf32>
    %340 = vector.broadcast %319 : vector<1x32xf32> to vector<8x32xf32>
    %341 = arith.mulf %339, %340 : vector<8x32xf32>
    %342 = vector.broadcast %321 : vector<1x32xf32> to vector<8x32xf32>
    %343 = arith.addf %341, %342 : vector<8x32xf32>
    %344 = vector.extract_strided_slice %343 {offsets = [0, 0], sizes = [1, 32], strides = [1, 1]} : vector<8x32xf32> to vector<1x32xf32>
    %345 = arith.truncf %344 : vector<1x32xf32> to vector<1x32xbf16>
    %c0_148 = arith.constant 0 : index
    %c0_149 = arith.constant 0 : index
    %346 = vector.load %arg17[%c0_148, %c0_149] : memref<32x128xbf16, #tpu.memory_space<vmem>>, vector<32x128xbf16>
    %cst_150 = arith.constant dense<0.000000e+00> : vector<1x128xf32>
    %347 = tpu.matmul %345, %346, %cst_150 {dimension_numbers = #tpu.dot_dimension_numbers<[1], [0], [0], [1], [0, 0, 1, 1], [], []>} : vector<1x32xbf16>, vector<32x128xbf16>, vector<1x128xf32> -> vector<1x128xf32>
    %c0_151 = arith.constant 0 : index
    %c0_152 = arith.constant 0 : index
    %348 = vector.load %arg18[%c0_151, %c0_152] : memref<1x128xf32, #tpu.memory_space<vmem>>, vector<1x128xf32>
    %349 = arith.addf %347, %348 : vector<1x128xf32>
    %350 = vector.shape_cast %349 : vector<1x128xf32> to vector<1x128xf32>
    %351 = vector.broadcast %350 : vector<1x128xf32> to vector<8x128xf32>
    %c0_153 = arith.constant 0 : index
    %c0_154 = arith.constant 0 : index
    %c0_155 = arith.constant 0 : index
    %352 = vector.load %arg19[%c0_153, %c0_154, %c0_155] : memref<1x8x128xf32, #tpu.memory_space<vmem>>, vector<1x8x128xf32>
    %353 = vector.shape_cast %352 : vector<1x8x128xf32> to vector<8x128xf32>
    %354 = vector.shape_cast %351 : vector<8x128xf32> to vector<1x8x128xf32>
    tpu.vector_store %arg19[%c0_153, %c0_154, %c0_155], %354 {strides = array<i32>} : memref<1x8x128xf32, #tpu.memory_space<vmem>>, vector<1x8x128xf32>,
    return
  }
  func.func @transform_0(%arg0: i32) -> (i32, i32, i32) {
    %c0_i32 = arith.constant 0 : i32
    %c0_i32_0 = arith.constant 0 : i32
    %c0_i32_1 = arith.constant 0 : i32
    return %arg0, %c0_i32, %c0_i32_0 : i32, i32, i32
  }
  func.func @transform_1(%arg0: i32) -> (i32, i32, i32) {
    %c0_i32 = arith.constant 0 : i32
    %c0_i32_0 = arith.constant 0 : i32
    %c0_i32_1 = arith.constant 0 : i32
    return %arg0, %c0_i32, %c0_i32_0 : i32, i32, i32
  }
  func.func @transform_2(%arg0: i32) -> (i32, i32) {
    %c0_i32 = arith.constant 0 : i32
    %c0_i32_0 = arith.constant 0 : i32
    %c0_i32_1 = arith.constant 0 : i32
    return %c0_i32, %c0_i32_0 : i32, i32
  }
  func.func @transform_3(%arg0: i32) -> (i32, i32) {
    %c0_i32 = arith.constant 0 : i32
    %c0_i32_0 = arith.constant 0 : i32
    %c0_i32_1 = arith.constant 0 : i32
    return %c0_i32, %c0_i32_0 : i32, i32
  }
  func.func @transform_4(%arg0: i32) -> (i32, i32, i32) {
    %c0_i32 = arith.constant 0 : i32
    %c0_i32_0 = arith.constant 0 : i32
    %c0_i32_1 = arith.constant 0 : i32
    %c0_i32_2 = arith.constant 0 : i32
    return %c0_i32, %c0_i32_0, %c0_i32_1 : i32, i32, i32
  }
  func.func @transform_5(%arg0: i32) -> (i32, i32, i32) {
    %c0_i32 = arith.constant 0 : i32
    %c0_i32_0 = arith.constant 0 : i32
    %c0_i32_1 = arith.constant 0 : i32
    %c0_i32_2 = arith.constant 0 : i32
    return %c0_i32, %c0_i32_0, %c0_i32_1 : i32, i32, i32
  }
  func.func @transform_6(%arg0: i32) -> (i32, i32, i32) {
    %c0_i32 = arith.constant 0 : i32
    %c0_i32_0 = arith.constant 0 : i32
    %c0_i32_1 = arith.constant 0 : i32
    %c0_i32_2 = arith.constant 0 : i32
    return %c0_i32, %c0_i32_0, %c0_i32_1 : i32, i32, i32
  }
  func.func @transform_7(%arg0: i32) -> (i32, i32, i32) {
    %c0_i32 = arith.constant 0 : i32
    %c0_i32_0 = arith.constant 0 : i32
    %c0_i32_1 = arith.constant 0 : i32
    %c0_i32_2 = arith.constant 0 : i32
    return %c0_i32, %c0_i32_0, %c0_i32_1 : i32, i32, i32
  }
  func.func @transform_8(%arg0: i32) -> (i32, i32, i32) {
    %c0_i32 = arith.constant 0 : i32
    %c0_i32_0 = arith.constant 0 : i32
    %c0_i32_1 = arith.constant 0 : i32
    %c0_i32_2 = arith.constant 0 : i32
    return %c0_i32, %c0_i32_0, %c0_i32_1 : i32, i32, i32
  }
  func.func @transform_9(%arg0: i32) -> (i32, i32, i32) {
    %c0_i32 = arith.constant 0 : i32
    %c0_i32_0 = arith.constant 0 : i32
    %c0_i32_1 = arith.constant 0 : i32
    %c0_i32_2 = arith.constant 0 : i32
    return %c0_i32, %c0_i32_0, %c0_i32_1 : i32, i32, i32
  }
  func.func @transform_10(%arg0: i32) -> (i32, i32, i32) {
    %c0_i32 = arith.constant 0 : i32
    %c0_i32_0 = arith.constant 0 : i32
    %c0_i32_1 = arith.constant 0 : i32
    %c0_i32_2 = arith.constant 0 : i32
    return %c0_i32, %c0_i32_0, %c0_i32_1 : i32, i32, i32
  }
  func.func @transform_11(%arg0: i32) -> (i32, i32, i32) {
    %c0_i32 = arith.constant 0 : i32
    %c0_i32_0 = arith.constant 0 : i32
    %c0_i32_1 = arith.constant 0 : i32
    %c0_i32_2 = arith.constant 0 : i32
    return %c0_i32, %c0_i32_0, %c0_i32_1 : i32, i32, i32
  }
  func.func @transform_12(%arg0: i32) -> (i32, i32, i32) {
    %c0_i32 = arith.constant 0 : i32
    %c0_i32_0 = arith.constant 0 : i32
    %c0_i32_1 = arith.constant 0 : i32
    %c0_i32_2 = arith.constant 0 : i32
    return %c0_i32, %c0_i32_0, %c0_i32_1 : i32, i32, i32
  }
  func.func @transform_13(%arg0: i32) -> (i32, i32, i32) {
    %c0_i32 = arith.constant 0 : i32
    %c0_i32_0 = arith.constant 0 : i32
    %c0_i32_1 = arith.constant 0 : i32
    %c0_i32_2 = arith.constant 0 : i32
    return %c0_i32, %c0_i32_0, %c0_i32_1 : i32, i32, i32
  }
  func.func @transform_14(%arg0: i32) -> (i32, i32, i32) {
    %c0_i32 = arith.constant 0 : i32
    %c0_i32_0 = arith.constant 0 : i32
    %c0_i32_1 = arith.constant 0 : i32
    %c0_i32_2 = arith.constant 0 : i32
    return %c0_i32, %c0_i32_0, %c0_i32_1 : i32, i32, i32
  }
  func.func @transform_15(%arg0: i32) -> (i32, i32, i32) {
    %c0_i32 = arith.constant 0 : i32
    %c0_i32_0 = arith.constant 0 : i32
    %c0_i32_1 = arith.constant 0 : i32
    %c0_i32_2 = arith.constant 0 : i32
    return %c0_i32, %c0_i32_0, %c0_i32_1 : i32, i32, i32
  }
  func.func @transform_16(%arg0: i32) -> (i32, i32) {
    %c0_i32 = arith.constant 0 : i32
    %c0_i32_0 = arith.constant 0 : i32
    %c0_i32_1 = arith.constant 0 : i32
    return %c0_i32, %c0_i32_0 : i32, i32
  }
  func.func @transform_17(%arg0: i32) -> (i32, i32) {
    %c0_i32 = arith.constant 0 : i32
    %c0_i32_0 = arith.constant 0 : i32
    %c0_i32_1 = arith.constant 0 : i32
    return %c0_i32, %c0_i32_0 : i32, i32
  }
  func.func @transform_18(%arg0: i32) -> (i32, i32, i32) {
    %c0_i32 = arith.constant 0 : i32
    %c0_i32_0 = arith.constant 0 : i32
    %c0_i32_1 = arith.constant 0 : i32
    return %arg0, %c0_i32, %c0_i32_0 : i32, i32, i32
  }
}

</mosaic_0001>

<bundles_post_ra>
// kernel: custom_model_forward.1
= control target key start
LH: loop header
LB: loop body
LE: loop exit
PB: predicated region body
PF: predicated region fallthrough
CT: control target
= control target key end

     0   :  { %s3233_s27 = smov 0   ;;  %s3651_s0 = inlined_call_operand.vmem [shape: f32[2,8,32], index: 0, kind: input, shape index: {}]   ;;  %s3652_s1 = inlined_call_operand.vmem [shape: f32[2,1,8], index: 1, kind: input, shape index: {}]   ;;  %s3653_s2 = inlined_call_operand.vmem [shape: f32[1,32], index: 2, kind: input, shape index: {}]   ;;  %s3654_s3 = inlined_call_operand.vmem [shape: f32[1,32], index: 3, kind: input, shape index: {}]   ;;  %s3655_s4 = inlined_call_operand.vmem [shape: bf16[2,32,96], index: 4, kind: input, shape index: {}]   ;;  %s3656_s5 = inlined_call_operand.vmem [shape: f32[2,1,96], index: 5, kind: input, shape index: {}]   ;;  %s3657_s6 = inlined_call_operand.vmem [shape: bf16[2,32,32], index: 6, kind: input, shape index: {}]   ;;  %s3658_s7 = inlined_call_operand.vmem [shape: f32[2,1,32], index: 7, kind: input, shape index: {}]   ;;  %s3659_s8 = inlined_call_operand.vmem [shape: f32[2,1,32], index: 8, kind: input, shape index: {}]   ;;  %s3660_s9 = inlined_call_operand.vmem [shape: f32[2,1,32], index: 9, kind: input, shape index: {}]   ;;  %s3661_s10 = inlined_call_operand.vmem [shape: bf16[2,32,64], index: 10, kind: input, shape index: {}]   ;;  %s3662_s11 = inlined_call_operand.vmem [shape: f32[2,1,64], index: 11, kind: input, shape index: {}]   ;;  %s3663_s12 = inlined_call_operand.vmem [shape: bf16[2,64,32], index: 12, kind: input, shape index: {}]   ;;  %s3664_s13 = inlined_call_operand.vmem [shape: f32[2,1,32], index: 13, kind: input, shape index: {}]   ;;  %s3665_s14 = inlined_call_operand.vmem [shape: f32[2,1,32], index: 14, kind: input, shape index: {}]   ;;  %s3666_s15 = inlined_call_operand.vmem [shape: f32[2,1,32], index: 15, kind: input, shape index: {}]   ;;  %s3667_s16 = inlined_call_operand.vmem [shape: bf16[32,128], index: 16, kind: input, shape index: {}]   ;;  %s3668_s17 = inlined_call_operand.vmem [shape: f32[1,128], index: 17, kind: input, shape index: {}]   ;;  %s3669_s18 = inlined_call_operand.vmem [shape: f32[2,8,128], index: 18, kind: output, shape index: {}]  }
   0x1   :  { %3676 = sst [smem:[#allocation2_spill]] %s3651_s0 }
   0x2   :  { %3677 = sst [smem:[#allocation3_spill]] %s3652_s1 }
   0x3   :  { %3678 = sst [smem:[#allocation4_spill]] %s3653_s2 }
   0x4 LB: > { %s2646_s28 = sadd.s32 4294967295, %s3123_s27   ;;  %p2650_p0 = scmp.ge.s32.totalorder %s3123_s27, 1  ;;  %s3123_s27 = sphi %s3233_s27, %s28_s27  }
   0x5   : > { %p519_p1 = scmp.lt.s32.totalorder %s3123_s27, 3 }
   0x7   : > { %p520_p2 = pnand %p2650_p0, %p519_p1 }
   0x8   : > { %p574_p3 = scmp.lt.s32.totalorder (!%p520_p2), %s2646_s28, 1  ;;  %vm589_vm0 = vcmask (!%p520_p2), 261120   ;;  %s3679_s19 = sld [smem:[#allocation2_spill]] (!%p520_p2)  ;;  %v3053_v4 = vld [vmem:[%s3655_s4] sm:$0xff] (!%p520_p2)   ;;  %v3125_v5 = vmov (!%p520_p2), 0.0   ;;  %vm3126_vm1 = vmmov (!%p520_p2), 0  }
   0x9   : > { %523 = sbr.rel (%p520_p2) target bundleno = 5082 (0x13da), region = 92  ;;  %2824 = vmatprep.subr.bf16.mxu0 (!%p520_p2), %v3125_v5  ;;  %2828 = vmatprep.mubr.msk.bf16.mxu0 (!%p520_p2), %vm3126_vm1, %v3125_v5  ;;  %v3054_v6 = vld [vmem:[%s3655_s4 + $0x8] sm:$0xff] (!%p520_p2)   ;;  %s3680_s25 = sld [smem:[#allocation4_spill]] (!%p520_p2)  ;;  %v2654_v18 = vld [vmem:[%s3654_s3] ss:$0 sm:$0xff] (!%p520_p2)  ;;  %vm692_vm2 = vcmask (!%p520_p2), 64512  }
   0xa   : > { %2825 = vmatpush3.bf16.msra.mxu0 (!%p520_p2), %v3053_v4  ;;  %2832 = vmatprep.subr.bf16.mxu1 (!%p520_p2), %v3125_v5  ;;  %v2655_v22 = vld [vmem:[%s3656_s5] ss:$0 sm:$0xff] (!%p520_p2)  ;;  %s3128_s20 = smov (!%p520_p2), 96   ;;  %s3129_s21 = smov (!%p520_p2), 88   ;;  %vm954_vm3 = vcmask (!%p520_p2), 1043456   ;;  %vm1492_vm4 = vcmask (!%p520_p2), 523264  }
   0xb   : > { %2826 = vmatprep.subr.bf16.mxu0 (!%p520_p2), %v3125_v5  ;;  %2834 = vmatprep.mubr.msk.bf16.mxu1 (!%p520_p2), %vm3126_vm1, %v3125_v5  ;;  %s3130_s22 = smov (!%p520_p2), 80   ;;  %s3131_s2 = smov (!%p520_p2), 72  }
   0xc   : > { %s3675_s23 = smov (!%p520_p2), 112   ;;  %s3133_s24 = smov (!%p520_p2), 104  }
   0xd   : > { %s3681_s30 = sld [smem:[#allocation3_spill]] (!%p520_p2)  ;;  %s3672_s26 = smov (!%p520_p2), 40  }
   0xe   : > { %2827 = vmatpush3.bf16.msra.mxu0 (!%p520_p2), %v3054_v6 }
   0xf   : > { %2838 = vmatprep.subr.bf16.mxu0 (!%p520_p2), %v3125_v5  ;;  %v2653_v16 = vld [vmem:[%s3680_s25] ss:$0 sm:$0xff] (!%p520_p2)  ;;  %s3673_s25 = smov (!%p520_p2), 48  }
  0x10   : > { %s3689_s28 = smov (!%p574_p3, %s2646_s28), 1 }
  0x11   : > { %s3670_s29 = sshll.u32 %s3689_s28, 3 }
  0x12   : > { %s577_s1 = scalar_lea.vmem %s3679_s19, %s3670_s29  ;;  %s3674_s19 = smov 56  }
  0x13   : > { %v586_v0 = vld [vmem:[%s577_s1] sm:$0xff]  ;;  %s3127_s1 = smov 120   ;;  %s580_s0 = scalar_lea.vmem %s3681_s30, %s3689_s28 }
  0x14   : > { %v590_v1 = vsel %vm589_vm0, %v586_v0, 0.0  ;;  %v595_v2 = vmul.f32 %v586_v0, %v586_v0  ;;  %v3322_v40 = vld [vmem:[%s580_s0] ss:$0 sm:$0xff]  ;;  %s3671_s30 = smov 64  }
  0x15   : > { %591 = vadd.xlane.f32.xlu0 %v590_v1 }
  0x16   : > { %v596_v3 = vsel %vm589_vm0, %v595_v2, 0.0 }
  0x19   : > { %597 = vadd.xlane.f32.xlu0 %v596_v3 }
  0xa2   : > { %v592_v7 = vpop.xlane.xlu0 %591 }
  0xa3   : > { %v594_v8 = vmul.f32 0.03125, %v592_v7 }
  0xa5   : > { %v600_v10 = vmul.f32 %v594_v8, %v594_v8  ;;  %v602_v14 = vsub.f32 %v586_v0, %v594_v8 }
  0xa6   : > { %v598_v9 = vpop.xlane.xlu0 %597 }
  0xa7   : > { %v599_v11 = vmul.f32 0.03125, %v598_v9 }
  0xa9   : > { %v601_v12 = vsub.f32 %v599_v11, %v600_v10 }
  0xab   : > { %v603_v13 = vadd.f32 1e-05, %v601_v12 }
  0xad   : > { %3071 = vrsqrt.f32 %v603_v13 }
  0xb7   : > { %v3072_v15 = vpop.eup %3071 }
  0xb8   : > { %v605_v17 = vmul.f32 %v3072_v15, %v602_v14 }
  0xba   : > { %v612_v19 = vmul.f32 %v2653_v16, %v605_v17 }
  0xbc   : > { %v3271_v20 = vadd.f32 %v2654_v18, %v612_v19 }
  0xbe   : > { %v621_v21 = vpack.c.bf16 %v3271_v20, %v3271_v20 }
  0xc0   : > { %2829 = vmatmul.mubr.msk.bf16.vlgmr.msra.gmra.mrb[0].mxu0 %vm589_vm0, %v621_v21 }
  0xc1   : > { %2840 = vmatprep.mubr.msk.bf16.mxu0 %vm3126_vm1, %v3125_v5 }
 0x193   : > { %v682_v23 = vpop.f32.mrb[0].mxu0 }
 0x194   : > { %v683_v24 = vadd.f32 %v2655_v22, %v682_v23  ;;  %v2830_v25 = vpop.f32.mrb[1].mxu0 }
 0x195   : > { %v685_v26 = vpop.f32.mrb[2].mxu0 }
 0x196   : > { %v3281_v27 = vpack.c.bf16 %v683_v24, %v683_v24  ;;  %v2831_v28 = vpop.f32.mrb[3].mxu0 }
 0x198   : > { %739 = vrot.lane.b32.xlu0 %v3281_v27, %s3127_s1  ;;  %690 = vrot.lane.b32.xlu1 %v3281_v27, %s3128_s20 }
 0x19c   : > { %741 = vrot.lane.b32.xlu1 %v3281_v27, %s3129_s21 }
 0x1a0   : > { %791 = vrot.lane.b32.xlu1 %v3281_v27, %s3130_s22 }
 0x1a4   : > { %841 = vrot.lane.b32.xlu1 %v3281_v27, %s3131_s2 }
 0x1a8   : > { %789 = vrot.lane.b32.xlu1 %v3281_v27, %s3675_s23 }
 0x1ac   : > { %839 = vrot.lane.b32.xlu1 %v3281_v27, %s3133_s24 }
 0x20a   : > { %v691_v29 = vpop.permute.xlu1 %690  ;;  %v740_v35 = vpop.permute.xlu0 %739 }
 0x20b   : > { %v697_v30 = vsel %vm692_vm2, %v691_v29, 0 }
 0x20c   : > { %2833 = vmatpush3.bf16.xpose.msra.mxu1 %v697_v30 }
 0x20d   : > { %2844 = vmatprep.subr.bf16.mxu1 %v3125_v5 }
 0x20e   : > { %v742_v31 = vpop.permute.xlu1 %741 }
 0x20f   : > { %v747_v32 = vsel %vm692_vm2, %v742_v31, 0 }
 0x210   : > { %2839 = vmatpush3.bf16.xpose.msra.mxu0 %v747_v32 }
 0x211   : > { %2850 = vmatprep.subr.bf16.mxu0 %v3125_v5 }
 0x212   : > { %v792_v33 = vpop.permute.xlu1 %791 }
 0x213   : > { %v797_v34 = vsel %vm692_vm2, %v792_v33, 0  ;;  %2835 = vmatmul.mubr.msk.bf16.vlgmr.msra.gmra.mrb[0].mxu1 %vm692_vm2, %v3281_v27 }
 0x214   : > { %2845 = vmatpush3.bf16.xpose.msra.mxu1 %v797_v34  ;;  %2846 = vmatprep.mubr.msk.bf16.mxu1 %vm3126_vm1, %v3125_v5 }
 0x215   : > { %2856 = vmatprep.subr.bf16.mxu1 %v3125_v5 }
 0x216   : > { %v842_v36 = vpop.permute.xlu1 %841 }
 0x217   : > { %v847_v37 = vsel %vm692_vm2, %v842_v36, 0  ;;  %2841 = vmatmul.mubr.msk.bf16.vlgmr.msra.gmra.mrb[4].mxu0 %vm692_vm2, %v740_v35 }
 0x218   : > { %2851 = vmatpush3.bf16.xpose.msra.mxu0 %v847_v37  ;;  %2852 = vmatprep.mubr.msk.bf16.mxu0 %vm3126_vm1, %v3125_v5  ;;  %v946_v37 = vld [vmem:[%s3657_s6 + $0x4] sm:$0xf] }
 0x219   : > { %2862 = vmatprep.subr.bf16.mxu0 %v3125_v5 }
 0x21a   : > { %v790_v38 = vpop.permute.xlu1 %789 }
 0x21b   : > { %2847 = vmatmul.mubr.msk.bf16.vlgmr.msra.gmra.mrb[4].mxu1 %vm692_vm2, %v790_v38 }
 0x21c   : > { %2858 = vmatprep.mubr.msk.bf16.mxu1 %vm3126_vm1, %v3125_v5 }
 0x21e   : > { %v840_v39 = vpop.permute.xlu1 %839 }
 0x21f   : > { %2853 = vmatmul.mubr.msk.bf16.vlgmr.msra.gmra.mrb[8].mxu0 %vm692_vm2, %v840_v39  ;;  %v1054_v39 = vsel %vm954_vm3, %v946_v37, 0 }
 0x220   : > { %2864 = vmatprep.mubr.msk.bf16.mxu0 %vm3126_vm1, %v3125_v5 }
 0x2e6   : > { %v733_v41 = vpop.f32.mrb[0].mxu1 }
 0x2e7   : > { %v895_v42 = vadd.f32 %v3322_v40, %v733_v41  ;;  %v2836_v43 = vpop.f32.mrb[1].mxu1 }
 0x2e8   : > { %v736_v44 = vpop.f32.mrb[2].mxu1 }
 0x2e9   : > { %v2837_v45 = vpop.f32.mrb[3].mxu1  ;;  %v899_v46 = vsel %vm692_vm2, %v895_v42, -inf }
 0x2ea   : > { %900 = vmax.xlane.f32.xlu1 %v899_v46  ;;  %v783_v47 = vpop.f32.mrb[4].mxu0 }
 0x2eb   : > { %v896_v48 = vadd.f32 %v3322_v40, %v783_v47  ;;  %v2842_v49 = vpop.f32.mrb[5].mxu0 }
 0x2ec   : > { %v786_v50 = vpop.f32.mrb[6].mxu0 }
 0x2ed   : > { %v2843_v51 = vpop.f32.mrb[7].mxu0  ;;  %v902_v52 = vsel %vm692_vm2, %v896_v48, -inf }
 0x2ee   : > { %v833_v53 = vpop.f32.mrb[4].mxu1  ;;  %903 = vmax.xlane.f32.xlu0 %v902_v52 }
 0x2ef   : > { %v2848_v54 = vpop.f32.mrb[5].mxu1  ;;  %v897_v7 = vadd.f32 %v3322_v40, %v833_v53 }
 0x2f0   : > { %v836_v55 = vpop.f32.mrb[6].mxu1 }
 0x2f1   : > { %v2849_v56 = vpop.f32.mrb[7].mxu1  ;;  %v905_v10 = vsel %vm692_vm2, %v897_v7, -inf  ;;  %v945_v55 = vld [vmem:[%s3657_s6] sm:$0xf] }
 0x2f2   : > { %v883_v57 = vpop.f32.mrb[8].mxu0  ;;  %v1100_v56 = vsel %vm954_vm3, %v945_v55, 0 }
 0x2f3   : > { %v2854_v58 = vpop.f32.mrb[9].mxu0  ;;  %v898_v9 = vadd.f32 %v3322_v40, %v883_v57  ;;  %v947_v57 = vld [vmem:[%s3657_s6 + $0x8] sm:$0xf] }
 0x2f4   : > { %v886_v59 = vpop.f32.mrb[10].mxu0 }
 0x2f5   : > { %v2855_v60 = vpop.f32.mrb[11].mxu0  ;;  %v908_v11 = vsel %vm692_vm2, %v898_v9, -inf }
 0x377   : > { %v901_v61 = vpop.xlane.xlu1 %900 }
 0x378   : > { %v911_v62 = vsub.f32 %v895_v42, %v901_v61  ;;  %v1195_v61 = vsel %vm954_vm3, %v947_v57, 0  ;;  %v3058_v57 = vld [vmem:[%s3663_s12 + $0x8] sm:$0xff]  }
 0x37a   : > { %v915_v63 = vmul.f32 1.442695, %v911_v62 }
 0x37b   : > { %v904_v0 = vpop.xlane.xlu0 %903 }
 0x37c   : > { %3073 = vpow2.f32 %v915_v63  ;;  %v912_v1 = vsub.f32 %v896_v48, %v904_v0 }
 0x37e   : > { %v917_v2 = vmul.f32 1.442695, %v912_v1 }
 0x380   : > { %3075 = vpow2.f32 %v917_v2 }
 0x386   : > { %v3074_v3 = vpop.eup %3073 }
 0x387   : > { %v923_v4 = vsel %vm692_vm2, %v3074_v3, 0.0 }
 0x388   : > { %924 = vadd.xlane.f32.xlu1 %v923_v4  ;;  %v948_v4 = vld [vmem:[%s3657_s6 + $0xc] sm:$0xf] }
 0x38a   : > { %v3076_v6 = vpop.eup %3075 }
 0x38b   : > { %v926_v8 = vsel %vm692_vm2, %v3076_v6, 0.0 }
 0x38c   : > { %927 = vadd.xlane.f32.xlu0 %v926_v8 }
 0x390   : > { %906 = vmax.xlane.f32.xlu0 %v905_v10 }
 0x394   : > { %909 = vmax.xlane.f32.xlu0 %v908_v11 }
 0x399   : > { %1001 = vrot.lane.b32.xlu1 %v3281_v27, %s3674_s19 }
 0x39d   : > { %1142 = vrot.lane.b32.xlu1 %v3281_v27, %s3673_s25  ;;  %s3682_s25 = smov 112  }
 0x3a1   : > { %1240 = vrot.lane.b32.xlu1 %v3281_v27, %s3672_s26 }
 0x415   : > { %v925_v12 = vpop.xlane.xlu1 %924 }
 0x416   : > { %3077 = vrcp.f32 %v925_v12 }
 0x419   : > { %v1002_v13 = vpop.permute.xlu1 %1001  ;;  %v928_v14 = vpop.xlane.xlu0 %927 }
 0x41a   : > { %v1007_v15 = vsel %vm954_vm3, %v1002_v13, 0  ;;  %3079 = vrcp.f32 %v928_v14 }
 0x41b   : > { %2863 = vmatpush3.bf16.msra.mxu0 %v1007_v15 }
 0x41c   : > { %2874 = vmatprep.subr.bf16.mxu0 %v3125_v5 }
 0x41d   : > { %v907_v16 = vpop.xlane.xlu0 %906 }
 0x41e   : > { %v913_v17 = vsub.f32 %v897_v7, %v907_v16 }
 0x420   : > { %v919_v18 = vmul.f32 1.442695, %v913_v17  ;;  %v3078_v21 = vpop.eup %3077 }
 0x421   : > { %v910_v19 = vpop.xlane.xlu0 %909  ;;  %v939_v25 = vmul.f32 %v3078_v21, %v3074_v3 }
 0x422   : > { %3081 = vpow2.f32 %v919_v18  ;;  %v914_v22 = vsub.f32 %v898_v9, %v910_v19  ;;  %v1293_v9 = vsel %vm954_vm3, %v948_v4, 0 }
 0x424   : > { %v3080_v23 = vpop.eup %3079  ;;  %v921_v24 = vmul.f32 1.442695, %v914_v22 }
 0x425   : > { %v940_v26 = vmul.f32 %v3080_v23, %v3076_v6 }
 0x426   : > { %3083 = vpow2.f32 %v921_v24 }
 0x427   : > { %v943_v28 = vpack.c.bf16 %v940_v26, %v939_v25 }
 0x429   : > { %v1000_v29 = vrot.slane %v943_v28, 4 }
 0x42b   : > { %2865 = vmatmul.mubr.msk.bf16.vlgmr.msra.gmra.mrb[12].mxu0 %vm692_vm2, %v1000_v29 }
 0x42c   : > { %v3082_v30 = vpop.eup %3081  ;;  %2876 = vmatprep.mubr.msk.bf16.mxu0 %vm3126_vm1, %v3125_v5  ;;  %2875 = vmatpush3.bf16.msra.mxu0 %v1100_v56  ;;  %v3057_v56 = vld [vmem:[%s3663_s12] sm:$0xff]  }
 0x42d   : > { %v929_v31 = vsel %vm692_vm2, %v3082_v30, 0.0  ;;  %2886 = vmatprep.subr.bf16.mxu0 %v3125_v5 }
 0x42e   : > { %930 = vadd.xlane.f32.xlu0 %v929_v31 }
 0x430   : > { %v3084_v32 = vpop.eup %3083 }
 0x431   : > { %v932_v33 = vsel %vm692_vm2, %v3084_v32, 0.0 }
 0x432   : > { %933 = vadd.xlane.f32.xlu0 %v932_v33 }
 0x448   : > { %949 = vrot.lane.b32.xlu0 %v3281_v27, %s3671_s30  ;;  %v1143_v27 = vpop.permute.xlu1 %1142 }
 0x449   : > { %v1148_v46 = vsel %vm954_vm3, %v1143_v27, 0  ;;  %v3055_v27 = vld [vmem:[%s3661_s10] sm:$0xff]  }
 0x44c   : > { %v1241_v51 = vpop.permute.xlu1 %1240 }
 0x44d   : > { %v1246_v53 = vsel %vm954_vm3, %v1241_v51, 0 }
 0x4bb   : > { %v931_v34 = vpop.xlane.xlu0 %930 }
 0x4bf   : > { %v934_v35 = vpop.xlane.xlu0 %933 }
 0x4c0   : > { %3085 = vrcp.f32 %v934_v35 }
 0x4c1   : > { %3087 = vrcp.f32 %v931_v34 }
 0x4c3   : > { %v950_v36 = vpop.permute.xlu0 %949 }
 0x4c4   : > { %v956_v38 = vsel %vm954_vm3, %v950_v36, 0 }
 0x4c5   : > { %2857 = vmatpush3.bf16.msra.mxu1 %v956_v38 }
 0x4c6   : > { %2868 = vmatprep.subr.bf16.mxu1 %v3125_v5 }
 0x4c8   : > { %2859 = vmatmul.mubr.msk.bf16.vlgmr.msra.gmra.mrb[8].mxu1 %vm692_vm2, %v943_v28 }
 0x4c9   : > { %2869 = vmatpush3.bf16.msra.mxu1 %v1054_v39  ;;  %2870 = vmatprep.mubr.msk.bf16.mxu1 %vm3126_vm1, %v3125_v5 }
 0x4ca   : > { %2880 = vmatprep.subr.bf16.mxu1 %v3125_v5  ;;  %v3086_v44 = vpop.eup %3085 }
 0x4cb   : > { %v3088_v48 = vpop.eup %3087  ;;  %v942_v49 = vmul.f32 %v3086_v44, %v3084_v32 }
 0x4cc   : > { %v941_v50 = vmul.f32 %v3088_v48, %v3082_v30  ;;  %v2672_v30 = vld [vmem:[%s3658_s7] ss:$0 sm:$0xff] }
 0x4ce   : > { %v944_v52 = vpack.c.bf16 %v942_v49, %v941_v50  ;;  %v2673_v50 = vld [vmem:[%s3659_s8] ss:$0 sm:$0xff] }
 0x4d0   : > { %v1239_v54 = vrot.slane %v944_v52, 4 }
 0x4fe   : > { %v1043_v41 = vpop.f32.mrb[12].mxu0 }
 0x4ff   : > { %v1049_v42 = vpack.c.bf16 %v1043_v41, %v1043_v41  ;;  %v2866_v43 = vpop.f32.mrb[13].mxu0  ;;  %v3056_v41 = vld [vmem:[%s3661_s10 + $0x8] sm:$0xff]  }
 0x500   : > { %v1046_v45 = vpop.f32.mrb[14].mxu0 }
 0x501   : > { %v2867_v47 = vpop.f32.mrb[15].mxu0  ;;  %2871 = vmatmul.mubr.msk.bf16.vlgmr.msra.gmra.mrb[12].mxu1 %vm692_vm2, %v1049_v42 }
 0x502   : > { %2881 = vmatpush3.bf16.msra.mxu1 %v1148_v46  ;;  %2882 = vmatprep.mubr.msk.bf16.mxu1 %vm3126_vm1, %v3125_v5 }
 0x503   : > { %2892 = vmatprep.subr.bf16.mxu1 %v3125_v5 }
 0x509   : > { %2883 = vmatmul.mubr.msk.bf16.vlgmr.msra.gmra.mrb[16].mxu1 %vm692_vm2, %v944_v52  ;;  %v2674_v52 = vld [vmem:[%s3660_s9] ss:$0 sm:$0xff] }
 0x50a   : > { %2893 = vmatpush3.bf16.msra.mxu1 %v1246_v53  ;;  %2894 = vmatprep.mubr.msk.bf16.mxu1 %vm3126_vm1, %v3125_v5 }
 0x50b   : > { %2904 = vmatprep.subr.bf16.mxu1 %v3125_v5 }
 0x511   : > { %2895 = vmatmul.mubr.msk.bf16.vlgmr.msra.gmra.mrb[20].mxu1 %vm692_vm2, %v1239_v54 }
 0x512   : > { %2908 = vmatprep.mubr.msk.bf16.mxu1 %vm3126_vm1, %v3125_v5  ;;  %2905 = vmatpush3.bf16.msra.mxu1 %v3055_v27 }
 0x513   : > { %2906 = vmatprep.subr.bf16.mxu1 %v3125_v5 }
 0x516   : > { %2907 = vmatpush3.bf16.msra.mxu1 %v3056_v41 }
 0x517   : > { %2924 = vmatprep.subr.bf16.mxu1 %v3125_v5 }
 0x59b   : > { %v992_v58 = vpop.f32.mrb[8].mxu1 }
 0x59c   : > { %v998_v59 = vpack.c.bf16 %v992_v58, %v992_v58  ;;  %v2860_v60 = vpop.f32.mrb[9].mxu1  ;;  %v3059_v58 = vld [vmem:[%s3663_s12 + $0x10] sm:$0xff]  }
 0x59d   : > { %v995_v62 = vpop.f32.mrb[10].mxu1  ;;  %v2675_v60 = vld [vmem:[%s3662_s11] ss:$0 sm:$0xff] }
 0x59e   : > { %v2861_v63 = vpop.f32.mrb[11].mxu1  ;;  %2877 = vmatmul.mubr.msk.bf16.vlgmr.msra.gmra.mrb[16].mxu0 %vm692_vm2, %v998_v59  ;;  %v3060_v59 = vld [vmem:[%s3663_s12 + $0x18] sm:$0xff]  }
 0x59f   : > { %2887 = vmatpush3.bf16.msra.mxu0 %v1195_v61  ;;  %2888 = vmatprep.mubr.msk.bf16.mxu0 %vm3126_vm1, %v3125_v5 }
 0x5a0   : > { %2898 = vmatprep.subr.bf16.mxu0 %v3125_v5 }
 0x5d4   : > { %v1090_v0 = vpop.f32.mrb[12].mxu1 }
 0x5d5   : > { %v2872_v1 = vpop.f32.mrb[13].mxu1 }
 0x5d6   : > { %v1093_v2 = vpop.f32.mrb[14].mxu1 }
 0x5d7   : > { %v2873_v3 = vpop.f32.mrb[15].mxu1 }
 0x5dc   : > { %v1184_v6 = vpop.f32.mrb[16].mxu1 }
 0x5dd   : > { %v1190_v7 = vpack.c.bf16 %v1184_v6, %v1184_v6  ;;  %v2884_v8 = vpop.f32.mrb[17].mxu1 }
 0x5de   : > { %v1187_v10 = vpop.f32.mrb[18].mxu1 }
 0x5df   : > { %v2885_v11 = vpop.f32.mrb[19].mxu1  ;;  %2889 = vmatmul.mubr.msk.bf16.vlgmr.msra.gmra.mrb[20].mxu0 %vm692_vm2, %v1190_v7 }
 0x5e0   : > { %2899 = vmatpush3.bf16.msra.mxu0 %v1293_v9  ;;  %2900 = vmatprep.mubr.msk.bf16.mxu0 %vm3126_vm1, %v3125_v5 }
 0x5e1   : > { %2912 = vmatprep.subr.bf16.mxu0 %v3125_v5 }
 0x5e4   : > { %v1282_v12 = vpop.f32.mrb[20].mxu1 }
 0x5e5   : > { %v1288_v13 = vpack.c.bf16 %v1282_v12, %v1282_v12  ;;  %v2896_v14 = vpop.f32.mrb[21].mxu1 }
 0x5e6   : > { %v1285_v15 = vpop.f32.mrb[22].mxu1 }
 0x5e7   : > { %v2897_v16 = vpop.f32.mrb[23].mxu1  ;;  %2901 = vmatmul.mubr.msk.bf16.vlgmr.msra.gmra.mrb[24].mxu0 %vm692_vm2, %v1288_v13  ;;  %v2679_v13 = vld [vmem:[%s3664_s13] ss:$0 sm:$0xff] }
 0x5e8   : > { %2920 = vmatprep.mubr.msk.bf16.mxu0 %vm3126_vm1, %v3125_v5  ;;  %2913 = vmatpush3.bf16.msra.mxu0 %v3057_v56 }
 0x5e9   : > { %2914 = vmatprep.subr.bf16.mxu0 %v3125_v5 }
 0x5ec   : > { %2915 = vmatpush3.bf16.msra.mxu0 %v3058_v57 }
 0x5ed   : > { %2916 = vmatprep.subr.bf16.mxu0 %v3125_v5 }
 0x5f0   : > { %2917 = vmatpush3.bf16.msra.mxu0 %v3059_v58 }
 0x5f1   : > { %2918 = vmatprep.subr.bf16.mxu0 %v3125_v5 }
 0x5f4   : > { %2919 = vmatpush3.bf16.msra.mxu0 %v3060_v59 }
 0x5f5   : > { %2938 = vmatprep.subr.bf16.mxu0 %v3125_v5 }
 0x671   : > { %v1136_v17 = vpop.f32.mrb[16].mxu0 }
 0x672   : > { %v1137_v18 = vadd.f32 %v1136_v17, %v1090_v0  ;;  %v2878_v19 = vpop.f32.mrb[17].mxu0 }
 0x673   : > { %v1139_v21 = vpop.f32.mrb[18].mxu0 }
 0x674   : > { %v2879_v22 = vpop.f32.mrb[19].mxu0 }
 0x6b2   : > { %v1231_v23 = vpop.f32.mrb[20].mxu0 }
 0x6b3   : > { %v1237_v24 = vadd.f32 %v1231_v23, %v1137_v18  ;;  %v2890_v25 = vpop.f32.mrb[21].mxu0 }
 0x6b4   : > { %v1234_v26 = vpop.f32.mrb[22].mxu0  ;;  %v3062_v25 = vld [vmem:[%s3655_s4 + $0x18] sm:$0xff]  }
 0x6b5   : > { %v2891_v28 = vpop.f32.mrb[23].mxu0 }
 0x6ba   : > { %v1329_v29 = vpop.f32.mrb[24].mxu0 }
 0x6bb   : > { %v1335_v31 = vadd.f32 %v1329_v29, %v1237_v24  ;;  %v2902_v32 = vpop.f32.mrb[25].mxu0  ;;  %v3061_v24 = vld [vmem:[%s3655_s4 + $0x10] sm:$0xff]  }
 0x6bc   : > { %v1332_v33 = vpop.f32.mrb[26].mxu0 }
 0x6bd   : > { %v1343_v34 = vadd.f32 %v2672_v30, %v1335_v31  ;;  %v2903_v35 = vpop.f32.mrb[27].mxu0 }
 0x6bf   : > { %v1344_v36 = vadd.f32 %v1343_v34, %v3271_v20 }
 0x6c1   : > { %v1347_v37 = vsel %vm589_vm0, %v1344_v36, 0.0  ;;  %v1351_v38 = vmul.f32 %v1344_v36, %v1344_v36 }
 0x6c2   : > { %1348 = vadd.xlane.f32.xlu1 %v1347_v37 }
 0x6c3   : > { %v1352_v39 = vsel %vm589_vm0, %v1351_v38, 0.0  ;;  %v2686_v38 = vld [vmem:[%s3666_s15] ss:$0 sm:$0xff] }
 0x6c4   : > { %1353 = vadd.xlane.f32.xlu0 %v1352_v39 }
 0x74f   : > { %v1349_v20 = vpop.xlane.xlu1 %1348 }
 0x750   : > { %v1350_v42 = vmul.f32 0.03125, %v1349_v20  ;;  %v2692_v20 = vld [vmem:[%s3656_s5 + $0x1] ss:$0 sm:$0xff] }
 0x751   : > { %v1354_v43 = vpop.xlane.xlu0 %1353 }
 0x752   : > { %v1356_v44 = vmul.f32 %v1350_v42, %v1350_v42  ;;  %v1355_v45 = vmul.f32 0.03125, %v1354_v43  ;;  %v1358_v48 = vsub.f32 %v1344_v36, %v1350_v42  ;;  %v2685_v36 = vld [vmem:[%s3665_s14] ss:$0 sm:$0xff] }
 0x754   : > { %v1357_v46 = vsub.f32 %v1355_v45, %v1356_v44 }
 0x756   : > { %v1359_v47 = vadd.f32 1e-05, %v1357_v46 }
 0x758   : > { %3089 = vrsqrt.f32 %v1359_v47 }
 0x762   : > { %v3090_v49 = vpop.eup %3089 }
 0x763   : > { %v1361_v51 = vmul.f32 %v3090_v49, %v1358_v48 }
 0x765   : > { %v1368_v53 = vmul.f32 %v2673_v50, %v1361_v51 }
 0x767   : > { %v1375_v54 = vadd.f32 %v2674_v52, %v1368_v53 }
 0x769   : > { %v1376_v55 = vpack.c.bf16 %v1375_v54, %v1375_v54 }
 0x76b   : > { %2909 = vmatmul.mubr.msk.bf16.vlgmr.msra.gmra.mrb[24].mxu1 %vm589_vm0, %v1376_v55 }
 0x76c   : > { %2928 = vmatprep.mubr.msk.bf16.mxu1 %vm3126_vm1, %v3125_v5  ;;  %2925 = vmatpush3.bf16.msra.mxu1 %v3061_v24 }
 0x76d   : > { %2926 = vmatprep.subr.bf16.mxu1 %v3125_v5 }
 0x770   : > { %2927 = vmatpush3.bf16.msra.mxu1 %v3062_v25 }
 0x771   : > { %2932 = vmatprep.subr.bf16.mxu1 %v3125_v5 }
 0x83e   : > { %v1437_v61 = vpop.f32.mrb[24].mxu1 }
 0x83f   : > { %v1438_v62 = vadd.f32 %v2675_v60, %v1437_v61  ;;  %v2910_v63 = vpop.f32.mrb[25].mxu1 }
 0x840   : > { %v1440_v0 = vpop.f32.mrb[26].mxu1 }
 0x841   : > { %v1443_v1 = vmul.f32 %v1438_v62, %v1438_v62  ;;  %v2911_v2 = vpop.f32.mrb[27].mxu1 }
 0x843   : > { %v1444_v3 = vmul.f32 %v1443_v1, %v1438_v62 }
 0x845   : > { %v1445_v4 = vmul.f32 0.044715, %v1444_v3 }
 0x847   : > { %v1446_v6 = vadd.f32 %v1445_v4, %v1438_v62 }
 0x849   : > { %v1447_v7 = vmul.f32 0.7978846, %v1446_v6 }
 0x84b   : > { %3091 = vtanh.f32 %v1447_v7 }
 0x855   : > { %v3092_v8 = vpop.eup %3091 }
 0x856   : > { %v1449_v9 = vadd.f32 1.0, %v3092_v8 }
 0x858   : > { %v1450_v10 = vmul.f32 0.5, %v1449_v9 }
 0x85a   : > { %v1451_v11 = vmul.f32 %v1450_v10, %v1438_v62 }
 0x85c   : > { %v1452_v12 = vpack.c.bf16 %v1451_v11, %v1451_v11 }
 0x85e   : > { %2921 = vmatmul.mubr.msk.bf16.vlgmr.msra.gmra.mrb[28].mxu0 %vm1492_vm4, %v1452_v12 }
 0x85f   : > { %2940 = vmatprep.mubr.msk.bf16.mxu0 %vm3126_vm1, %v3125_v5 }
 0x931   : > { %v1530_v14 = vpop.f32.mrb[28].mxu0 }
 0x932   : > { %v1531_v15 = vadd.f32 %v2679_v13, %v1530_v14  ;;  %v2922_v16 = vpop.f32.mrb[29].mxu0 }
 0x933   : > { %v1533_v17 = vpop.f32.mrb[30].mxu0 }
 0x934   : > { %v1536_v18 = vadd.f32 %v1531_v15, %v1375_v54  ;;  %v2923_v19 = vpop.f32.mrb[31].mxu0 }
 0x936   : > { %v1539_v21 = vsel %vm589_vm0, %v1536_v18, 0.0  ;;  %v1543_v22 = vmul.f32 %v1536_v18, %v1536_v18 }
 0x937   : > { %1540 = vadd.xlane.f32.xlu1 %v1539_v21 }
 0x938   : > { %v1544_v23 = vsel %vm589_vm0, %v1543_v22, 0.0 }
 0x93b   : > { %1545 = vadd.xlane.f32.xlu1 %v1544_v23 }
 0x9c4   : > { %v1541_v26 = vpop.xlane.xlu1 %1540 }
 0x9c5   : > { %v1542_v28 = vmul.f32 0.03125, %v1541_v26 }
 0x9c7   : > { %v1548_v30 = vmul.f32 %v1542_v28, %v1542_v28  ;;  %v1550_v34 = vsub.f32 %v1536_v18, %v1542_v28 }
 0x9c8   : > { %v1546_v29 = vpop.xlane.xlu1 %1545 }
 0x9c9   : > { %v1547_v31 = vmul.f32 0.03125, %v1546_v29 }
 0x9cb   : > { %v1549_v32 = vsub.f32 %v1547_v31, %v1548_v30 }
 0x9cd   : > { %v1551_v33 = vadd.f32 1e-05, %v1549_v32 }
 0x9cf   : > { %3093 = vrsqrt.f32 %v1551_v33 }
 0x9d9   : > { %v3094_v35 = vpop.eup %3093 }
 0x9da   : > { %v1553_v37 = vmul.f32 %v3094_v35, %v1550_v34 }
 0x9dc   : > { %v1560_v39 = vmul.f32 %v2685_v36, %v1553_v37 }
 0x9de   : > { %v3460_v27 = vadd.f32 %v2686_v38, %v1560_v39 }
 0x9e0   : > { %v1568_v41 = vpack.c.bf16 %v3460_v27, %v3460_v27 }
 0x9e2   : > { %2929 = vmatmul.mubr.msk.bf16.vlgmr.msra.gmra.mrb[28].mxu1 %vm589_vm0, %v1568_v41 }
 0x9e3   : > { %2934 = vmatprep.mubr.msk.bf16.mxu1 %vm3126_vm1, %v3125_v5 }
 0xab5   : > { %v1631_v42 = vpop.f32.mrb[28].mxu1 }
 0xab6   : > { %v1632_v43 = vadd.f32 %v2692_v20, %v1631_v42  ;;  %v2930_v44 = vpop.f32.mrb[29].mxu1 }
 0xab7   : > { %v1634_v45 = vpop.f32.mrb[30].mxu1 }
 0xab8   : > { %v3470_v46 = vpack.c.bf16 %v1632_v43, %v1632_v43  ;;  %v2931_v47 = vpop.f32.mrb[31].mxu1 }
 0xaba   : > { %1689 = vrot.lane.b32.xlu0 %v3470_v46, %s3129_s21  ;;  %1639 = vrot.lane.b32.xlu1 %v3470_v46, %s3128_s20  ;;  %s3684_s20 = smov 48   ;;  %s3685_s21 = smov 40  }
 0xabe   : > { %1789 = vrot.lane.b32.xlu0 %v3470_v46, %s3131_s2  ;;  %1687 = vrot.lane.b32.xlu1 %v3470_v46, %s3127_s1  ;;  %s3683_s1 = smov 56  }
 0xac2   : > { %1787 = vrot.lane.b32.xlu0 %v3470_v46, %s3133_s24  ;;  %1739 = vrot.lane.b32.xlu1 %v3470_v46, %s3130_s22  ;;  %s3686_s22 = smov 64   ;;  %s3687_s24 = sshll.u32 %s3689_s28, 3 }
 0xac3   : > { %s584_s30 = scalar_lea.vmem %s3669_s18, %s3687_s24 }
 0xac6   : > { %1737 = vrot.lane.b32.xlu1 %v3470_v46, %s3682_s25 }
 0xb2c   : > { %v1690_v48 = vpop.permute.xlu0 %1689  ;;  %v1640_v49 = vpop.permute.xlu1 %1639 }
 0xb2d   : > { %v1695_v50 = vsel %vm692_vm2, %v1690_v48, 0  ;;  %v1645_v51 = vsel %vm692_vm2, %v1640_v49, 0 }
 0xb2e   : > { %2933 = vmatpush3.bf16.xpose.msra.mxu1 %v1645_v51  ;;  %2939 = vmatpush3.bf16.xpose.msra.mxu0 %v1695_v50 }
 0xb2f   : > { %2944 = vmatprep.subr.bf16.mxu1 %v3125_v5  ;;  %2950 = vmatprep.subr.bf16.mxu0 %v3125_v5 }
 0xb30   : > { %v1688_v52 = vpop.permute.xlu1 %1687  ;;  %v1790_v53 = vpop.permute.xlu0 %1789 }
 0xb31   : > { %v1795_v55 = vsel %vm692_vm2, %v1790_v53, 0 }
 0xb34   : > { %v1740_v54 = vpop.permute.xlu1 %1739  ;;  %v1788_v57 = vpop.permute.xlu0 %1787 }
 0xb35   : > { %v1745_v56 = vsel %vm692_vm2, %v1740_v54, 0  ;;  %2935 = vmatmul.mubr.msk.bf16.vlgmr.msra.gmra.mrb[32].mxu1 %vm692_vm2, %v3470_v46  ;;  %2941 = vmatmul.mubr.msk.bf16.vlgmr.msra.gmra.mrb[32].mxu0 %vm692_vm2, %v1688_v52 }
 0xb36   : > { %2945 = vmatpush3.bf16.xpose.msra.mxu1 %v1745_v56  ;;  %2951 = vmatpush3.bf16.xpose.msra.mxu0 %v1795_v55  ;;  %v2701_v55 = vld [vmem:[%s3657_s6 + $0x14] sm:$0xf] }
 0xb37   : > { %2946 = vmatprep.mubr.msk.bf16.mxu1 %vm3126_vm1, %v3125_v5  ;;  %2952 = vmatprep.mubr.msk.bf16.mxu0 %vm3126_vm1, %v3125_v5 }
 0xb38   : > { %2962 = vmatprep.subr.bf16.mxu0 %v3125_v5  ;;  %2956 = vmatprep.subr.bf16.mxu1 %v3125_v5  ;;  %v1738_v58 = vpop.permute.xlu1 %1737 }
 0xb3d   : > { %2947 = vmatmul.mubr.msk.bf16.vlgmr.msra.gmra.mrb[36].mxu1 %vm692_vm2, %v1738_v58  ;;  %2953 = vmatmul.mubr.msk.bf16.vlgmr.msra.gmra.mrb[36].mxu0 %vm692_vm2, %v1788_v57  ;;  %v1996_v57 = vsel %vm954_vm3, %v2701_v55, 0 }
 0xb3e   : > { %2964 = vmatprep.mubr.msk.bf16.mxu0 %vm3126_vm1, %v3125_v5  ;;  %2958 = vmatprep.mubr.msk.bf16.mxu1 %vm3126_vm1, %v3125_v5 }
 0xc08   : > { %v1681_v59 = vpop.f32.mrb[32].mxu1  ;;  %v1731_v60 = vpop.f32.mrb[32].mxu0 }
 0xc09   : > { %v1837_v61 = vadd.f32 %v3322_v40, %v1681_v59  ;;  %v1838_v62 = vadd.f32 %v3322_v40, %v1731_v60  ;;  %v2936_v63 = vpop.f32.mrb[33].mxu1  ;;  %v2942_v0 = vpop.f32.mrb[33].mxu0 }
 0xc0a   : > { %v1684_v1 = vpop.f32.mrb[34].mxu1  ;;  %v1734_v2 = vpop.f32.mrb[34].mxu0 }
 0xc0b   : > { %v2937_v3 = vpop.f32.mrb[35].mxu1  ;;  %v2943_v4 = vpop.f32.mrb[35].mxu0  ;;  %v1841_v6 = vsel %vm692_vm2, %v1837_v61, -inf  ;;  %v1844_v7 = vsel %vm692_vm2, %v1838_v62, -inf }
 0xc0c   : > { %1842 = vmax.xlane.f32.xlu1 %v1841_v6  ;;  %1845 = vmax.xlane.f32.xlu0 %v1844_v7 }
 0xc10   : > { %v1781_v8 = vpop.f32.mrb[36].mxu1  ;;  %v1831_v9 = vpop.f32.mrb[36].mxu0 }
 0xc11   : > { %v2948_v10 = vpop.f32.mrb[37].mxu1  ;;  %v2954_v11 = vpop.f32.mrb[37].mxu0  ;;  %v1839_v26 = vadd.f32 %v3322_v40, %v1781_v8  ;;  %v1840_v29 = vadd.f32 %v3322_v40, %v1831_v9  ;;  %v2700_v9 = vld [vmem:[%s3657_s6 + $0x10] sm:$0xf] }
 0xc12   : > { %v1784_v12 = vpop.f32.mrb[38].mxu1  ;;  %v1834_v13 = vpop.f32.mrb[38].mxu0  ;;  %v2042_v10 = vsel %vm954_vm3, %v2700_v9, 0  ;;  %v2702_v11 = vld [vmem:[%s3657_s6 + $0x18] sm:$0xf]  ;;  %v3065_v9 = vld [vmem:[%s3663_s12 + $0x20] sm:$0xff]  }
 0xc13   : > { %v2949_v14 = vpop.f32.mrb[39].mxu1  ;;  %v2955_v15 = vpop.f32.mrb[39].mxu0  ;;  %v1847_v30 = vsel %vm692_vm2, %v1839_v26, -inf  ;;  %v1850_v31 = vsel %vm692_vm2, %v1840_v29, -inf }
 0xc14   : > { %v2137_v15 = vsel %vm954_vm3, %v2702_v11, 0  ;;  %v3067_v11 = vld [vmem:[%s3663_s12 + $0x30] sm:$0xff]  }
 0xc99   : > { %v1843_v16 = vpop.xlane.xlu1 %1842  ;;  %v1846_v17 = vpop.xlane.xlu0 %1845 }
 0xc9a   : > { %v1853_v18 = vsub.f32 %v1837_v61, %v1843_v16  ;;  %v1854_v19 = vsub.f32 %v1838_v62, %v1846_v17 }
 0xc9c   : > { %v1857_v21 = vmul.f32 1.442695, %v1853_v18  ;;  %v1859_v22 = vmul.f32 1.442695, %v1854_v19 }
 0xc9e   : > { %3095 = vpow2.f32 %v1857_v21 }
 0xc9f   : > { %3097 = vpow2.f32 %v1859_v22 }
 0xca8   : > { %v3096_v23 = vpop.eup %3095 }
 0xca9   : > { %v3098_v24 = vpop.eup %3097  ;;  %v1865_v25 = vsel %vm692_vm2, %v3096_v23, 0.0 }
 0xcaa   : > { %1866 = vadd.xlane.f32.xlu0 %v1865_v25  ;;  %v1868_v28 = vsel %vm692_vm2, %v3098_v24, 0.0 }
 0xcab   : > { %1869 = vadd.xlane.f32.xlu1 %v1868_v28 }
 0xcaf   : > { %1848 = vmax.xlane.f32.xlu1 %v1847_v30 }
 0xcb3   : > { %1851 = vmax.xlane.f32.xlu1 %v1850_v31 }
 0xcc0   : > { %1943 = vrot.lane.b32.xlu0 %v3470_v46, %s3683_s1 }
 0xcc4   : > { %2084 = vrot.lane.b32.xlu0 %v3470_v46, %s3684_s20 }
 0xcc8   : > { %2182 = vrot.lane.b32.xlu0 %v3470_v46, %s3685_s21 }
 0xd37   : > { %v1867_v32 = vpop.xlane.xlu0 %1866 }
 0xd38   : > { %v1870_v33 = vpop.xlane.xlu1 %1869  ;;  %3099 = vrcp.f32 %v1867_v32 }
 0xd39   : > { %3101 = vrcp.f32 %v1870_v33 }
 0xd3b   : > { %v1944_v40 = vpop.permute.xlu0 %1943 }
 0xd3c   : > { %v1849_v34 = vpop.xlane.xlu1 %1848  ;;  %v1949_v35 = vsel %vm954_vm3, %v1944_v40, 0 }
 0xd3d   : > { %v1855_v36 = vsub.f32 %v1839_v26, %v1849_v34  ;;  %2963 = vmatpush3.bf16.msra.mxu0 %v1949_v35 }
 0xd3e   : > { %2974 = vmatprep.subr.bf16.mxu0 %v3125_v5 }
 0xd3f   : > { %v1861_v37 = vmul.f32 1.442695, %v1855_v36 }
 0xd40   : > { %v1852_v38 = vpop.xlane.xlu1 %1851 }
 0xd41   : > { %3103 = vpow2.f32 %v1861_v37  ;;  %v1856_v39 = vsub.f32 %v1840_v29, %v1852_v38 }
 0xd42   : > { %v3100_v41 = vpop.eup %3099 }
 0xd43   : > { %v3102_v20 = vpop.eup %3101  ;;  %v1881_v42 = vmul.f32 %v3100_v41, %v3096_v23  ;;  %v1863_v43 = vmul.f32 1.442695, %v1856_v39  ;;  %v2703_v23 = vld [vmem:[%s3657_s6 + $0x1c] sm:$0xf] }
 0xd44   : > { %v1882_v44 = vmul.f32 %v3102_v20, %v3098_v24  ;;  %v2235_v28 = vsel %vm954_vm3, %v2703_v23, 0 }
 0xd45   : > { %3105 = vpow2.f32 %v1863_v43 }
 0xd46   : > { %v1885_v45 = vpack.c.bf16 %v1882_v44, %v1881_v42 }
 0xd48   : > { %v1942_v47 = vrot.slane %v1885_v45, 4 }
 0xd4a   : > { %2965 = vmatmul.mubr.msk.bf16.vlgmr.msra.gmra.mrb[40].mxu0 %vm692_vm2, %v1942_v47  ;;  %v2713_v47 = vld [vmem:[%s3658_s7 + $0x1] ss:$0 sm:$0xff] }
 0xd4b   : > { %v3104_v48 = vpop.eup %3103  ;;  %2976 = vmatprep.mubr.msk.bf16.mxu0 %vm3126_vm1, %v3125_v5  ;;  %2975 = vmatpush3.bf16.msra.mxu0 %v2042_v10  ;;  %v3066_v10 = vld [vmem:[%s3663_s12 + $0x28] sm:$0xff]  }
 0xd4c   : > { %v1871_v49 = vsel %vm692_vm2, %v3104_v48, 0.0  ;;  %2986 = vmatprep.subr.bf16.mxu0 %v3125_v5 }
 0xd4d   : > { %1872 = vadd.xlane.f32.xlu1 %v1871_v49 }
 0xd4f   : > { %v3106_v50 = vpop.eup %3105 }
 0xd50   : > { %v1874_v51 = vsel %vm692_vm2, %v3106_v50, 0.0 }
 0xd51   : > { %1875 = vadd.xlane.f32.xlu1 %v1874_v51 }
 0xd62   : > { %1892 = vrot.lane.b32.xlu1 %v3470_v46, %s3686_s22  ;;  %v2085_v46 = vpop.permute.xlu0 %2084 }
 0xd63   : > { %v2090_v63 = vsel %vm954_vm3, %v2085_v46, 0  ;;  %v3064_v46 = vld [vmem:[%s3661_s10 + $0x18] sm:$0xff]  }
 0xd66   : > { %v2183_v4 = vpop.permute.xlu0 %2182 }
 0xd67   : > { %v2188_v7 = vsel %vm954_vm3, %v2183_v4, 0  ;;  %v2717_v4 = vld [vmem:[%s3660_s9 + $0x1] ss:$0 sm:$0xff] }
 0xdda   : > { %v1873_v52 = vpop.xlane.xlu1 %1872 }
 0xdde   : > { %v1876_v53 = vpop.xlane.xlu1 %1875 }
 0xddf   : > { %3107 = vrcp.f32 %v1876_v53 }
 0xde0   : > { %3109 = vrcp.f32 %v1873_v52 }
 0xde2   : > { %v1893_v54 = vpop.permute.xlu1 %1892 }
 0xde3   : > { %v1898_v56 = vsel %vm954_vm3, %v1893_v54, 0 }
 0xde4   : > { %2957 = vmatpush3.bf16.msra.mxu1 %v1898_v56 }
 0xde5   : > { %2968 = vmatprep.subr.bf16.mxu1 %v3125_v5 }
 0xde7   : > { %2959 = vmatmul.mubr.msk.bf16.vlgmr.msra.gmra.mrb[40].mxu1 %vm692_vm2, %v1885_v45 }
 0xde8   : > { %2969 = vmatpush3.bf16.msra.mxu1 %v1996_v57  ;;  %2970 = vmatprep.mubr.msk.bf16.mxu1 %vm3126_vm1, %v3125_v5  ;;  %v3063_v57 = vld [vmem:[%s3661_s10 + $0x10] sm:$0xff]  }
 0xde9   : > { %2980 = vmatprep.subr.bf16.mxu1 %v3125_v5  ;;  %v3108_v61 = vpop.eup %3107 }
 0xdea   : > { %v3110_v1 = vpop.eup %3109  ;;  %v1884_v2 = vmul.f32 %v3108_v61, %v3106_v50 }
 0xdeb   : > { %v1883_v3 = vmul.f32 %v3110_v1, %v3104_v48 }
 0xded   : > { %v1886_v6 = vpack.c.bf16 %v1884_v2, %v1883_v3  ;;  %v2716_v2 = vld [vmem:[%s3659_s8 + $0x1] ss:$0 sm:$0xff] }
 0xdef   : > { %v2181_v8 = vrot.slane %v1886_v6, 4 }
 0xe1d   : > { %v1985_v58 = vpop.f32.mrb[40].mxu0 }
 0xe1e   : > { %v1991_v59 = vpack.c.bf16 %v1985_v58, %v1985_v58  ;;  %v2966_v60 = vpop.f32.mrb[41].mxu0 }
 0xe1f   : > { %v1988_v62 = vpop.f32.mrb[42].mxu0 }
 0xe20   : > { %v2967_v0 = vpop.f32.mrb[43].mxu0  ;;  %2971 = vmatmul.mubr.msk.bf16.vlgmr.msra.gmra.mrb[44].mxu1 %vm692_vm2, %v1991_v59 }
 0xe21   : > { %2981 = vmatpush3.bf16.msra.mxu1 %v2090_v63  ;;  %2982 = vmatprep.mubr.msk.bf16.mxu1 %vm3126_vm1, %v3125_v5 }
 0xe22   : > { %2992 = vmatprep.subr.bf16.mxu1 %v3125_v5 }
 0xe28   : > { %2983 = vmatmul.mubr.msk.bf16.vlgmr.msra.gmra.mrb[48].mxu1 %vm692_vm2, %v1886_v6 }
 0xe29   : > { %2993 = vmatpush3.bf16.msra.mxu1 %v2188_v7  ;;  %2994 = vmatprep.mubr.msk.bf16.mxu1 %vm3126_vm1, %v3125_v5 }
 0xe2a   : > { %3004 = vmatprep.subr.bf16.mxu1 %v3125_v5 }
 0xe30   : > { %2995 = vmatmul.mubr.msk.bf16.vlgmr.msra.gmra.mrb[52].mxu1 %vm692_vm2, %v2181_v8 }
 0xe31   : > { %3008 = vmatprep.mubr.msk.bf16.mxu1 %vm3126_vm1, %v3125_v5  ;;  %3005 = vmatpush3.bf16.msra.mxu1 %v3063_v57  ;;  %v2579_v57 = vlaneseq }
 0xe32   : > { %3006 = vmatprep.subr.bf16.mxu1 %v3125_v5 }
 0xe35   : > { %3007 = vmatpush3.bf16.msra.mxu1 %v3064_v46  ;;  %v2580_v46 = vshrl.u32 %v2579_v57, 7 }
 0xe36   : > { %3024 = vmatprep.subr.bf16.mxu1 %v3125_v5 }
 0xeba   : > { %v1934_v12 = vpop.f32.mrb[40].mxu1 }
 0xebb   : > { %v1940_v13 = vpack.c.bf16 %v1934_v12, %v1934_v12  ;;  %v2960_v14 = vpop.f32.mrb[41].mxu1  ;;  %v3068_v12 = vld [vmem:[%s3663_s12 + $0x38] sm:$0xff]  }
 0xebc   : > { %v1937_v16 = vpop.f32.mrb[42].mxu1 }
 0xebd   : > { %v2961_v17 = vpop.f32.mrb[43].mxu1  ;;  %2977 = vmatmul.mubr.msk.bf16.vlgmr.msra.gmra.mrb[44].mxu0 %vm692_vm2, %v1940_v13  ;;  %v2723_v13 = vld [vmem:[%s3662_s11 + $0x1] ss:$0 sm:$0xff] }
 0xebe   : > { %2987 = vmatpush3.bf16.msra.mxu0 %v2137_v15  ;;  %2988 = vmatprep.mubr.msk.bf16.mxu0 %vm3126_vm1, %v3125_v5 }
 0xebf   : > { %2998 = vmatprep.subr.bf16.mxu0 %v3125_v5 }
 0xef3   : > { %v2032_v18 = vpop.f32.mrb[44].mxu1 }
 0xef4   : > { %v2972_v19 = vpop.f32.mrb[45].mxu1 }
 0xef5   : > { %v2035_v21 = vpop.f32.mrb[46].mxu1 }
 0xef6   : > { %v2973_v22 = vpop.f32.mrb[47].mxu1 }
 0xefb   : > { %v2126_v24 = vpop.f32.mrb[48].mxu1 }
 0xefc   : > { %v2132_v25 = vpack.c.bf16 %v2126_v24, %v2126_v24  ;;  %v2984_v26 = vpop.f32.mrb[49].mxu1 }
 0xefd   : > { %v2129_v29 = vpop.f32.mrb[50].mxu1 }
 0xefe   : > { %v2985_v30 = vpop.f32.mrb[51].mxu1  ;;  %2989 = vmatmul.mubr.msk.bf16.vlgmr.msra.gmra.mrb[48].mxu0 %vm692_vm2, %v2132_v25 }
 0xeff   : > { %2999 = vmatpush3.bf16.msra.mxu0 %v2235_v28  ;;  %3000 = vmatprep.mubr.msk.bf16.mxu0 %vm3126_vm1, %v3125_v5 }
 0xf00   : > { %3012 = vmatprep.subr.bf16.mxu0 %v3125_v5 }
 0xf03   : > { %v2224_v31 = vpop.f32.mrb[52].mxu1 }
 0xf04   : > { %v2230_v32 = vpack.c.bf16 %v2224_v31, %v2224_v31  ;;  %v2996_v33 = vpop.f32.mrb[53].mxu1  ;;  %v2736_v31 = vld [vmem:[%s3664_s13 + $0x1] ss:$0 sm:$0xff] }
 0xf05   : > { %v2227_v40 = vpop.f32.mrb[54].mxu1 }
 0xf06   : > { %v2997_v34 = vpop.f32.mrb[55].mxu1  ;;  %3001 = vmatmul.mubr.msk.bf16.vlgmr.msra.gmra.mrb[52].mxu0 %vm692_vm2, %v2230_v32 }
 0xf07   : > { %3020 = vmatprep.mubr.msk.bf16.mxu0 %vm3126_vm1, %v3125_v5  ;;  %3013 = vmatpush3.bf16.msra.mxu0 %v3065_v9 }
 0xf08   : > { %3014 = vmatprep.subr.bf16.mxu0 %v3125_v5 }
 0xf0b   : > { %3015 = vmatpush3.bf16.msra.mxu0 %v3066_v10 }
 0xf0c   : > { %3016 = vmatprep.subr.bf16.mxu0 %v3125_v5 }
 0xf0f   : > { %3017 = vmatpush3.bf16.msra.mxu0 %v3067_v11 }
 0xf10   : > { %3018 = vmatprep.subr.bf16.mxu0 %v3125_v5 }
 0xf13   : > { %3019 = vmatpush3.bf16.msra.mxu0 %v3068_v12 }
 0xf90   : > { %v2078_v35 = vpop.f32.mrb[44].mxu0 }
 0xf91   : > { %v2079_v36 = vadd.f32 %v2078_v35, %v2032_v18  ;;  %v2978_v37 = vpop.f32.mrb[45].mxu0 }
 0xf92   : > { %v2081_v38 = vpop.f32.mrb[46].mxu0 }
 0xf93   : > { %v2979_v39 = vpop.f32.mrb[47].mxu0 }
 0xfd1   : > { %v2173_v41 = vpop.f32.mrb[48].mxu0 }
 0xfd2   : > { %v2179_v20 = vadd.f32 %v2173_v41, %v2079_v36  ;;  %v2990_v42 = vpop.f32.mrb[49].mxu0  ;;  %v3069_v41 = vld [vmem:[%s3667_s16] sm:$0xff]  }
 0xfd3   : > { %v2176_v43 = vpop.f32.mrb[50].mxu0 }
 0xfd4   : > { %v2991_v44 = vpop.f32.mrb[51].mxu0 }
 0xfd9   : > { %v2271_v45 = vpop.f32.mrb[52].mxu0 }
 0xfda   : > { %v2277_v48 = vadd.f32 %v2271_v45, %v2179_v20  ;;  %v3002_v49 = vpop.f32.mrb[53].mxu0  ;;  %v3070_v20 = vld [vmem:[%s3667_s16 + $0x8] sm:$0xff]  }
 0xfdb   : > { %v2274_v50 = vpop.f32.mrb[54].mxu0 }
 0xfdc   : > { %v2286_v51 = vadd.f32 %v2713_v47, %v2277_v48  ;;  %v3003_v52 = vpop.f32.mrb[55].mxu0 }
 0xfdd   : > { %v2744_v52 = vld [vmem:[%s3665_s14 + $0x1] ss:$0 sm:$0xff] }
 0xfde   : > { %v2287_v53 = vadd.f32 %v2286_v51, %v3460_v27 }
 0xfe0   : > { %v2292_v54 = vsel %vm589_vm0, %v2287_v53, 0.0  ;;  %v2296_v55 = vmul.f32 %v2287_v53, %v2287_v53 }
 0xfe1   : > { %2293 = vadd.xlane.f32.xlu0 %v2292_v54 }
 0xfe2   : > { %v2297_v56 = vsel %vm589_vm0, %v2296_v55, 0.0 }
 0xfe3   : > { %2298 = vadd.xlane.f32.xlu1 %v2297_v56 }
0x106e   : > { %v2294_v27 = vpop.xlane.xlu0 %2293 }
0x106f   : > { %v2295_v58 = vmul.f32 0.03125, %v2294_v27  ;;  %v2523_v27 = vld [vmem:[%s3668_s17] sm:$0x1] }
0x1070   : > { %v2299_v59 = vpop.xlane.xlu1 %2298 }
0x1071   : > { %v2301_v60 = vmul.f32 %v2295_v58, %v2295_v58  ;;  %v2300_v61 = vmul.f32 0.03125, %v2299_v59  ;;  %v2303_v0 = vsub.f32 %v2287_v53, %v2295_v58  ;;  %v2581_v58 = vsub.s32 0, %v2580_v46 }
0x1073   : > { %v2302_v62 = vsub.f32 %v2300_v61, %v2301_v60 }
0x1075   : > { %v2304_v63 = vadd.f32 1e-05, %v2302_v62 }
0x1077   : > { %3111 = vrsqrt.f32 %v2304_v63 }
0x1081   : > { %v3112_v1 = vpop.eup %3111 }
0x1082   : > { %v2306_v3 = vmul.f32 %v3112_v1, %v2303_v0 }
0x1084   : > { %v2313_v6 = vmul.f32 %v2716_v2, %v2306_v3 }
0x1086   : > { %v2320_v7 = vadd.f32 %v2717_v4, %v2313_v6 }
0x1088   : > { %v2321_v8 = vpack.c.bf16 %v2320_v7, %v2320_v7 }
0x108a   : > { %3009 = vmatmul.mubr.msk.bf16.vlgmr.msra.gmra.mrb[56].mxu1 %vm589_vm0, %v2321_v8 }
0x108b   : > { %3028 = vmatprep.mubr.msk.bf16.mxu1 %vm3126_vm1, %v3125_v5  ;;  %3025 = vmatpush3.bf16.msra.mxu1 %v3069_v41 }
0x108c   : > { %3026 = vmatprep.subr.bf16.mxu1 %v3125_v5  ;;  %v2745_v5 = vld [vmem:[%s3666_s15 + $0x1] ss:$0 sm:$0xff] }
0x108f   : > { %3027 = vmatpush3.bf16.msra.mxu1 %v3070_v20 }
0x115d   : > { %v2384_v14 = vpop.f32.mrb[56].mxu1 }
0x115e   : > { %v2385_v15 = vadd.f32 %v2723_v13, %v2384_v14  ;;  %v3010_v16 = vpop.f32.mrb[57].mxu1 }
0x115f   : > { %v2387_v17 = vpop.f32.mrb[58].mxu1 }
0x1160   : > { %v2390_v18 = vmul.f32 %v2385_v15, %v2385_v15  ;;  %v3011_v19 = vpop.f32.mrb[59].mxu1 }
0x1162   : > { %v2391_v21 = vmul.f32 %v2390_v18, %v2385_v15 }
0x1164   : > { %v2392_v22 = vmul.f32 0.044715, %v2391_v21 }
0x1166   : > { %v2393_v23 = vadd.f32 %v2392_v22, %v2385_v15 }
0x1168   : > { %v2394_v24 = vmul.f32 0.7978846, %v2393_v23 }
0x116a   : > { %3113 = vtanh.f32 %v2394_v24 }
0x1174   : > { %v3114_v25 = vpop.eup %3113 }
0x1175   : > { %v2396_v26 = vadd.f32 1.0, %v3114_v25 }
0x1177   : > { %v2397_v28 = vmul.f32 0.5, %v2396_v26 }
0x1179   : > { %v2398_v29 = vmul.f32 %v2397_v28, %v2385_v15 }
0x117b   : > { %v2399_v30 = vpack.c.bf16 %v2398_v29, %v2398_v29 }
0x117d   : > { %3021 = vmatmul.mubr.msk.bf16.vlgmr.msra.gmra.mrb[56].mxu0 %vm1492_vm4, %v2399_v30 }
0x1250   : > { %v2478_v32 = vpop.f32.mrb[56].mxu0 }
0x1251   : > { %v2479_v33 = vadd.f32 %v2736_v31, %v2478_v32  ;;  %v3022_v40 = vpop.f32.mrb[57].mxu0 }
0x1252   : > { %v2481_v34 = vpop.f32.mrb[58].mxu0 }
0x1253   : > { %v2484_v35 = vadd.f32 %v2479_v33, %v2320_v7  ;;  %v3023_v36 = vpop.f32.mrb[59].mxu0 }
0x1255   : > { %v2489_v37 = vsel %vm589_vm0, %v2484_v35, 0.0  ;;  %v2493_v38 = vmul.f32 %v2484_v35, %v2484_v35 }
0x1256   : > { %2490 = vadd.xlane.f32.xlu0 %v2489_v37 }
0x1257   : > { %v2494_v39 = vsel %vm589_vm0, %v2493_v38, 0.0 }
0x125a   : > { %2495 = vadd.xlane.f32.xlu0 %v2494_v39 }
0x12e3   : > { %v2491_v42 = vpop.xlane.xlu0 %2490 }
0x12e4   : > { %v2492_v43 = vmul.f32 0.03125, %v2491_v42 }
0x12e6   : > { %v2498_v45 = vmul.f32 %v2492_v43, %v2492_v43  ;;  %v2500_v50 = vsub.f32 %v2484_v35, %v2492_v43 }
0x12e7   : > { %v2496_v44 = vpop.xlane.xlu0 %2495 }
0x12e8   : > { %v2497_v47 = vmul.f32 0.03125, %v2496_v44 }
0x12ea   : > { %v2499_v48 = vsub.f32 %v2497_v47, %v2498_v45 }
0x12ec   : > { %v2501_v49 = vadd.f32 1e-05, %v2499_v48 }
0x12ee   : > { %3115 = vrsqrt.f32 %v2501_v49 }
0x12f8   : > { %v3116_v51 = vpop.eup %3115 }
0x12f9   : > { %v2503_v53 = vmul.f32 %v3116_v51, %v2500_v50 }
0x12fb   : > { %v2510_v54 = vmul.f32 %v2744_v52, %v2503_v53 }
0x12fd   : > { %v2517_v55 = vadd.f32 %v2745_v5, %v2510_v54 }
0x12ff   : > { %v2518_v56 = vpack.c.bf16 %v2517_v55, %v2517_v55 }
0x1301   : > { %3029 = vmatmul.mubr.msk.bf16.vlgmr.msra.gmra.mrb[60].mxu1 %vm589_vm0, %v2518_v56 }
0x13d4   : > { %v2573_v59 = vpop.f32.mrb[60].mxu1 }
0x13d5   : > { %v2574_v60 = vadd.f32 %v2573_v59, %v2523_v27  ;;  %v3030_v61 = vpop.f32.mrb[61].mxu1 }
0x13d6   : > { %v2576_v62 = vpop.f32.mrb[62].mxu1 }
0x13d7   : > { %v2582_v63 = vrot.slane %v2574_v60, %v2581_v58  ;;  %v3031_v0 = vpop.f32.mrb[63].mxu1 }
0x13d9   : > { %2583 = vst [vmem:[%s584_s30] sm:$0xff] %v2582_v63 }
0x13da PF: > { %s28_s27 = sadd.s32 1, %s3123_s27  }
0x13db   : > { %p25_p4 = scmp.ge.s32.totalorder %s28_s27, 4  }
0x13dd   :  { %27 = sbr.rel (!%p25_p4) target bundleno = 4 (0x4), region = 137 }

</bundles_post_ra>
